<compile_context>
chip_gen: v5e
topology: v5e:2x2
jax: 0.10.0
libtpu: 0.0.40
codegen_flags: <defaults>
</compile_context>

<pallas_src>
import functools

import jax
import jax.numpy as jnp
import numpy as np
from jax.experimental import pallas as pl
from jax.experimental.pallas import tpu as pltpu


# ------------------------------ fused kernel ---------------------------------

def _rpp_fused_kernel(x_ref, w1_ref, sh1_ref, a1_ref,
                      wk1_ref, shf1_ref, af1_ref,
                      wf2_ref, shf2_ref, af2_ref,
                      wf3_ref, shf3_ref, af3_ref,
                      wd3_ref, o_ref,
                      slab1_ref, slab2_ref, *, C, H, W, dil):
  """One image per grid step.  All tensors are (channels, H*W) channels-first."""
  HW = H * W
  x = x_ref[0]                                        # (C, HW) f32

  # lane index -> w coordinate (computed once, reused by every shift).
  pos = jax.lax.broadcasted_iota(jnp.int32, (1, HW), 1)
  w_idx = pos % W

  def shift2d(xf, dh, dw):
    """out[c, h*W + w] = xf[c, (h+dh)*W + (w+dw)] if in-bounds else 0."""
    rows = xf.shape[0]
    off = dh * W + dw
    if off > 0:
      s = jnp.concatenate(
          [xf[:, off:], jnp.zeros((rows, off), xf.dtype)], axis=1)
    elif off < 0:
      s = jnp.concatenate(
          [jnp.zeros((rows, -off), xf.dtype), xf[:, :HW + off]], axis=1)
    else:
      s = xf
    if dw != 0:
      # h out-of-range is already covered by the zero fill above; only the
      # row-wrap along w needs masking.
      valid = (w_idx + dw >= 0) & (w_idx + dw < W)
      s = jnp.where(valid, s, 0.0)
    return s

  # ---- conv_dws1: dilated 3x3 (d=4) C -> 4C, BN scale folded into weights,
  # output channels pre-permuted so rows [s*C:(s+1)*C] are pixel-shuffle
  # subpixel s = 2*i + j  (i.e. the PixelShuffle(2) costs nothing).
  for kh in range(3):
    for kw in range(3):
      t = kh * 3 + kw
      slab1_ref[t * C:(t + 1) * C, :] = shift2d(
          x, (kh - 1) * dil, (kw - 1) * dil)
  y1 = jnp.dot(w1_ref[...], slab1_ref[...],
               preferred_element_type=jnp.float32)     # (4C, HW)
  y1 = y1 + sh1_ref[...]
  y1 = jnp.where(y1 > 0, y1, a1_ref[...] * y1)

  # ---- fusion[0]: 1x1 conv (duplicated-concat folded, BN scale folded,
  # expanded block-diagonally over the 4 subpixel groups) + shift + PReLU.
  u = jnp.dot(wk1_ref[...], y1, preferred_element_type=jnp.float32)  # (4C, HW)
  u = u + shf1_ref[...]
  u = jnp.where(u > 0, u, af1_ref[...] * u)

  # ---- fusion[1]: 3x3 conv (pad=1) at resolution (2H, 2W), in subpixel form.
  cache = {}

  def get_shifted(s_in, a, b):
    key = (s_in, a, b)
    if key not in cache:
      cache[key] = shift2d(u[s_in * C:(s_in + 1) * C, :], a, b)
    return cache[key]

  for i in range(2):
    for j in range(2):
      s_out = 2 * i + j
      for kh in range(3):
        for kw in range(3):
          t = kh * 3 + kw
          ii = i + kh - 1
          jj = j + kw - 1
          i2, a = ii % 2, ii // 2
          j2, b = jj % 2, jj // 2
          blk = get_shifted(2 * i2 + j2, a, b)
          slab2_ref[t * C:(t + 1) * C, s_out * HW:(s_out + 1) * HW] = blk
  t2 = jnp.dot(wf2_ref[...], slab2_ref[...],
               preferred_element_type=jnp.float32)     # (C, 4*HW)
  t2 = t2 + shf2_ref[...]
  t2 = jnp.where(t2 > 0, t2, af2_ref[...] * t2)

  # ---- fusion[2]: 1x1 conv + shift + PReLU.
  v = jnp.dot(wf3_ref[...], t2, preferred_element_type=jnp.float32)  # (C, 4HW)
  v = v + shf3_ref[...]
  v = jnp.where(v > 0, v, af3_ref[...] * v)

  # ---- conv_dws3(avgpool(x)) broadcast add.
  # wd3 @ mean(x) == mean(wd3 @ x); avoids an N=1 matmul.
  br3 = jnp.mean(jnp.dot(wd3_ref[...], x, preferred_element_type=jnp.float32),
                 axis=1, keepdims=True)                # (C, 1)
  o_ref[0] = v + br3                                   # (C, 4*HW) lane-dense


# -------------------------------- wrapper -------------------------------------

def _full_spec(shape):
  n = len(shape)
  return pl.BlockSpec(shape, lambda *_: (0,) * n)


def rpp_forward_pallas(x_nchw, p):
  B, C, H, W = x_nchw.shape
  HW = H * W
  x2 = x_nchw.reshape(B, C, HW)                        # free reshape

  kernel = functools.partial(_rpp_fused_kernel, C=C, H=H, W=W, dil=4)
  out = pl.pallas_call(
      kernel,
      out_shape=jax.ShapeDtypeStruct((B, C, 4 * HW), jnp.float32),
      grid=(B,),
      in_specs=[
          pl.BlockSpec((1, C, HW), lambda b: (b, 0, 0)),
          _full_spec((4 * C, 9 * C)),   # w1 (scaled, permuted)
          _full_spec((4 * C, 1)),       # sh1
          _full_spec((4 * C, 1)),       # a1
          _full_spec((4 * C, 4 * C)),   # kron(I4, wf1_eff_scaled)
          _full_spec((4 * C, 1)),       # shf1
          _full_spec((4 * C, 1)),       # af1
          _full_spec((C, 9 * C)),       # wf2 (scaled)
          _full_spec((C, 1)),           # shf2
          _full_spec((C, 1)),           # af2
          _full_spec((C, C)),           # wf3 (scaled)
          _full_spec((C, 1)),           # shf3
          _full_spec((C, 1)),           # af3
          _full_spec((C, C)),           # wd3
      ],
      out_specs=pl.BlockSpec((1, C, 4 * HW), lambda b: (b, 0, 0)),
      scratch_shapes=[
          pltpu.VMEM((9 * C, HW), jnp.float32),        # im2col slab, conv_dws1
          pltpu.VMEM((9 * C, 4 * HW), jnp.float32),    # im2col slab, fusion[1]
      ],
      compiler_params=pltpu.CompilerParams(dimension_semantics=("parallel",)),
  )(x2, p["w1"], p["sh1"], p["a1"], p["wk1"], p["shf1"], p["af1"],
    p["wf2"], p["shf2"], p["af2"], p["wf3"], p["shf3"], p["af3"], p["wd3"])

  # subpixel (s = 2i+j) layout -> NCHW (B, C, 2H, 2W); tiny XLA reshape+transpose
  # on the final output only (all intermediates stayed in VMEM).
  out = out.reshape(B, C, 2, 2, H, W).transpose(0, 1, 4, 2, 5, 3)
  return out.reshape(B, C, 2 * H, 2 * W)


# --------------------------- parameter preparation -----------------------------

def make_conv_weight(key, cout, cin, k):
  fan_in = cin * k * k
  std = (2.0 / fan_in) ** 0.5
  return std * jax.random.normal(key, (cout, cin, k, k), jnp.float32)


def make_bn_prelu_params(key, c):
  k1, k2, k3, k4 = jax.random.split(key, 4)
  gamma = jax.random.uniform(k1, (c,), jnp.float32, 0.5, 1.5)
  beta = 0.1 * jax.random.normal(k2, (c,), jnp.float32)
  running_mean = 0.1 * jax.random.normal(k3, (c,), jnp.float32)
  running_var = jax.random.uniform(k4, (c,), jnp.float32, 0.5, 1.5)
  eps = 1e-5
  scale = gamma / jnp.sqrt(running_var + eps)
  shift = beta - running_mean * scale
  alpha = jnp.full((c,), 0.25, jnp.float32)   # PReLU(num_parameters=c) default
  return scale, shift, alpha


def _conv3x3_to_mat(w_pt):
  # (Cout, Cin, 3, 3) -> (Cout, 9*Cin), column = (kh*3 + kw)*Cin + ci
  cout, cin = w_pt.shape[0], w_pt.shape[1]
  return jnp.transpose(w_pt, (0, 2, 3, 1)).reshape(cout, 9 * cin)


def prepare_rpp_params(C, w1_pt, bn1, wf1_pt, bnf1, wf2_pt, bnf2,
                       wf3_pt, bnf3, wd3_pt):
  s1, b1, a1 = bn1
  sf1, bf1, af1 = bnf1
  sf2, bf2, af2 = bnf2
  sf3, bf3, af3 = bnf3

  # conv_dws1: fold BN scale into the weight, permute output channels so rows
  # [s*C:(s+1)*C] correspond to pixel-shuffle subpixel s = 2*i + j
  # (PyTorch PixelShuffle: conv channel m = 4*c + 2*i + j).
  w1_mat = _conv3x3_to_mat(w1_pt)                              # (4C, 9C)
  perm = np.array([4 * c + s for s in range(4) for c in range(C)],
                  dtype=np.int32)
  w1_eff = (w1_mat * s1[:, None])[perm]
  sh1 = b1[perm][:, None]
  a1p = a1[perm][:, None]

  # fusion[0]: fold the duplicated-branch concat (both halves identical),
  # fold BN scale, expand block-diagonally over the 4 subpixel groups.
  wf1_mat = wf1_pt[:, :, 0, 0]                                 # (C, 2C)
  wf1_fold = wf1_mat[:, :C] + wf1_mat[:, C:]                   # (C, C)
  wk1 = jnp.kron(jnp.eye(4, dtype=jnp.float32), sf1[:, None] * wf1_fold)
  shf1 = jnp.tile(bf1, 4)[:, None]
  af1p = jnp.tile(af1, 4)[:, None]

  # fusion[1] / fusion[2]: fold BN scale into weights.
  wf2_eff = _conv3x3_to_mat(wf2_pt) * sf2[:, None]             # (C, 9C)
  wf3_eff = wf3_pt[:, :, 0, 0] * sf3[:, None]                  # (C, C)

  return dict(
      w1=w1_eff, sh1=sh1, a1=a1p,
      wk1=wk1, shf1=shf1, af1=af1p,
      wf2=wf2_eff, shf2=bf2[:, None], af2=af2[:, None],
      wf3=wf3_eff, shf3=bf3[:, None], af3=af3[:, None],
      wd3=wd3_pt[:, :, 0, 0])


# ------------------------------ JAX reference ---------------------------------

def _conv_ref(x, w_pt, pad, dil):
  return jax.lax.conv_general_dilated(
      x, w_pt, window_strides=(1, 1),
      padding=[(pad, pad), (pad, pad)], rhs_dilation=(dil, dil),
      dimension_numbers=("NCHW", "OIHW", "NCHW"))


def _conv_block_ref(x, w_pt, bn, pad, dil):
  scale, shift, alpha = bn
  y = _conv_ref(x, w_pt, pad, dil)
  y = y * scale[None, :, None, None] + shift[None, :, None, None]
  return jnp.where(y > 0, y, alpha[None, :, None, None] * y)


def _pixel_shuffle_nchw(x, r):
  B, Cr2, H, W = x.shape
  C = Cr2 // (r * r)
  x = x.reshape(B, C, r, r, H, W)
  x = x.transpose(0, 1, 4, 2, 5, 3)
  return x.reshape(B, C, H * r, W * r)


def rpp_reference(x, w1, bn1, wf1, bnf1, wf2, bnf2, wf3, bnf3, wd3):
  br1 = _pixel_shuffle_nchw(_conv_block_ref(x, w1, bn1, 4, 4), 2)
  b2 = br1                      # module calls conv_dws1 twice (conv_dws2 unused)
  out = jnp.concatenate([br1, b2], axis=1)
  out = _conv_block_ref(out, wf1, bnf1, 0, 1)
  out = _conv_block_ref(out, wf2, bnf2, 1, 1)
  out = _conv_block_ref(out, wf3, bnf3, 0, 1)
  xm = jnp.mean(x, axis=(2, 3), keepdims=True)
  br3 = _conv_ref(xm, wd3, 0, 1)
  return br3 + out


# ----------------------------------- main --------------------------------------

if __name__ == "__main__":
  key = jax.random.PRNGKey(0)
  ks = jax.random.split(key, 10)
  B, C, H, W = 2, 4, 16, 16
  x = jax.random.normal(ks[0], (B, C, H, W), jnp.float32)   # NCHW like PyTorch

  w1_pt = make_conv_weight(ks[1], 4 * C, C, 3)     # conv_dws1 conv
  bn1 = make_bn_prelu_params(ks[2], 4 * C)
  wf1_pt = make_conv_weight(ks[3], C, 2 * C, 1)    # fusion[0]
  bnf1 = make_bn_prelu_params(ks[4], C)
  wf2_pt = make_conv_weight(ks[5], C, C, 3)        # fusion[1]
  bnf2 = make_bn_prelu_params(ks[6], C)
  wf3_pt = make_conv_weight(ks[7], C, C, 1)        # fusion[2]
  bnf3 = make_bn_prelu_params(ks[8], C)
  wd3_pt = make_conv_weight(ks[9], C, C, 1)        # conv_dws3 (no bn/act)

  params = prepare_rpp_params(C, w1_pt, bn1, wf1_pt, bnf1, wf2_pt, bnf2,
                              wf3_pt, bnf3, wd3_pt)

  fwd = jax.jit(rpp_forward_pallas)
  out = jax.block_until_ready(fwd(x, params))
  assert out.shape == (B, C, 2 * H, 2 * W), out.shape

  ref = jax.block_until_ready(
      rpp_reference(x, w1_pt, bn1, wf1_pt, bnf1, wf2_pt, bnf2, wf3_pt, bnf3,
                    wd3_pt))
  rel = float(np.max(np.abs(np.asarray(out) - np.asarray(ref))) /
              (np.max(np.abs(np.asarray(ref))) + 1e-12))
  # default (bf16 MXU) precision in both kernel and reference -> ~1e-3 level
  if rel > 3e-2:
    raise AssertionError(f"Pallas output mismatch vs reference, rel err {rel}")

  print("KERNEL_OK")
</pallas_src>

<mosaic_0001>
module attributes {stable_mosaic.version = 11 : i64} {
  func.func @_rpp_fused_kernel(%arg0: i32, %arg1: memref<1x4x256xf32, #tpu.memory_space<vmem>>, %arg2: memref<16x36xf32, #tpu.memory_space<vmem>>, %arg3: memref<16x1xf32, #tpu.memory_space<vmem>>, %arg4: memref<16x1xf32, #tpu.memory_space<vmem>>, %arg5: memref<16x16xf32, #tpu.memory_space<vmem>>, %arg6: memref<16x1xf32, #tpu.memory_space<vmem>>, %arg7: memref<16x1xf32, #tpu.memory_space<vmem>>, %arg8: memref<4x36xf32, #tpu.memory_space<vmem>>, %arg9: memref<4x1xf32, #tpu.memory_space<vmem>>, %arg10: memref<4x1xf32, #tpu.memory_space<vmem>>, %arg11: memref<4x4xf32, #tpu.memory_space<vmem>>, %arg12: memref<4x1xf32, #tpu.memory_space<vmem>>, %arg13: memref<4x1xf32, #tpu.memory_space<vmem>>, %arg14: memref<4x4xf32, #tpu.memory_space<vmem>>, %arg15: memref<1x4x1024xf32, #tpu.memory_space<vmem>>, %arg16: memref<36x256xf32, #tpu.memory_space<vmem>>, %arg17: memref<36x1024xf32, #tpu.memory_space<vmem>>) attributes {dimension_semantics = [#tpu.dimension_semantics<parallel>], iteration_bounds = array<i64: 2>, scalar_prefetch = 0 : i64, scratch_operands = 2 : i64, tpu.core_type = #tpu.core_type<tc>, window_params = [{transform_indices = @transform_0, window_bounds = array<i64: 1, 4, 256>}, {pipeline_mode = #tpu.pipeline_mode<synchronous>, transform_indices = @transform_1, window_bounds = array<i64: 16, 36>}, {pipeline_mode = #tpu.pipeline_mode<synchronous>, transform_indices = @transform_2, window_bounds = array<i64: 16, 1>}, {pipeline_mode = #tpu.pipeline_mode<synchronous>, transform_indices = @transform_3, window_bounds = array<i64: 16, 1>}, {pipeline_mode = #tpu.pipeline_mode<synchronous>, transform_indices = @transform_4, window_bounds = array<i64: 16, 16>}, {pipeline_mode = #tpu.pipeline_mode<synchronous>, transform_indices = @transform_5, window_bounds = array<i64: 16, 1>}, {pipeline_mode = #tpu.pipeline_mode<synchronous>, transform_indices = @transform_6, window_bounds = array<i64: 16, 1>}, {pipeline_mode = #tpu.pipeline_mode<synchronous>, transform_indices = @transform_7, window_bounds = array<i64: 4, 36>}, {pipeline_mode = #tpu.pipeline_mode<synchronous>, transform_indices = @transform_8, window_bounds = array<i64: 4, 1>}, {pipeline_mode = #tpu.pipeline_mode<synchronous>, transform_indices = @transform_9, window_bounds = array<i64: 4, 1>}, {pipeline_mode = #tpu.pipeline_mode<synchronous>, transform_indices = @transform_10, window_bounds = array<i64: 4, 4>}, {pipeline_mode = #tpu.pipeline_mode<synchronous>, transform_indices = @transform_11, window_bounds = array<i64: 4, 1>}, {pipeline_mode = #tpu.pipeline_mode<synchronous>, transform_indices = @transform_12, window_bounds = array<i64: 4, 1>}, {pipeline_mode = #tpu.pipeline_mode<synchronous>, transform_indices = @transform_13, window_bounds = array<i64: 4, 4>}, {transform_indices = @transform_14, window_bounds = array<i64: 1, 4, 1024>}]} {
    %c0 = arith.constant 0 : index
    %c0_0 = arith.constant 0 : index
    %c0_1 = arith.constant 0 : index
    %0 = vector.load %arg1[%c0, %c0_0, %c0_1] : memref<1x4x256xf32, #tpu.memory_space<vmem>>, vector<1x4x256xf32>
    %1 = vector.shape_cast %0 : vector<1x4x256xf32> to vector<4x256xf32>
    %2 = tpu.iota {dimensions = array<i32: 1>} : vector<1x256xi32>
    %c16_i32 = arith.constant 16 : i32
    %c0_i32 = arith.constant 0 : i32
    %3 = arith.cmpi eq, %c16_i32, %c0_i32 : i32
    %c1_i32 = arith.constant 1 : i32
    %4 = arith.select %3, %c1_i32, %c16_i32 : i32
    %5 = vector.broadcast %4 : i32 to vector<1x256xi32>
    %6 = arith.remsi %2, %5 : vector<1x256xi32>
    %c0_i32_2 = arith.constant 0 : i32
    %7 = vector.broadcast %c0_i32_2 : i32 to vector<1x256xi32>
    %8 = arith.cmpi ne, %6, %7 : vector<1x256xi32>
    %c0_i32_3 = arith.constant 0 : i32
    %9 = vector.broadcast %c0_i32_3 : i32 to vector<1x256xi32>
    %10 = arith.cmpi slt, %6, %9 : vector<1x256xi32>
    %c0_i32_4 = arith.constant 0 : i32
    %11 = arith.cmpi slt, %4, %c0_i32_4 : i32
    %12 = vector.broadcast %11 : i1 to vector<1x256xi1>
    %13 = vector.broadcast %12 : vector<1x256xi1> to vector<1x256xi1>
    %14 = arith.xori %10, %13 : vector<1x256xi1>
    %15 = arith.andi %14, %8 : vector<1x256xi1>
    %16 = vector.broadcast %4 : i32 to vector<1x256xi32>
    %17 = arith.addi %6, %16 : vector<1x256xi32>
    %18 = arith.select %15, %17, %6 : vector<1x256xi1>, vector<1x256xi32>
    %cst = arith.constant 0.000000e+00 : f32
    %19 = vector.broadcast %cst : f32 to vector<4x68xf32>
    %20 = vector.extract_strided_slice %1 {offsets = [0, 0], sizes = [4, 188], strides = [1, 1]} : vector<4x256xf32> to vector<4x188xf32>
    %21 = tpu.concatenate %19, %20 in 1 : vector<4x68xf32>, vector<4x188xf32> -> vector<4x256xf32>
    %c-4_i32 = arith.constant -4 : i32
    %22 = vector.broadcast %c-4_i32 : i32 to vector<1x256xi32>
    %23 = arith.addi %18, %22 : vector<1x256xi32>
    %c0_i32_5 = arith.constant 0 : i32
    %24 = vector.broadcast %c0_i32_5 : i32 to vector<1x256xi32>
    %25 = arith.cmpi sge, %23, %24 : vector<1x256xi32>
    %c-4_i32_6 = arith.constant -4 : i32
    %26 = vector.broadcast %c-4_i32_6 : i32 to vector<1x256xi32>
    %27 = arith.addi %18, %26 : vector<1x256xi32>
    %c16_i32_7 = arith.constant 16 : i32
    %28 = vector.broadcast %c16_i32_7 : i32 to vector<1x256xi32>
    %29 = arith.cmpi slt, %27, %28 : vector<1x256xi32>
    %30 = arith.andi %25, %29 : vector<1x256xi1>
    %cst_8 = arith.constant 0.000000e+00 : f32
    %31 = vector.shape_cast %30 : vector<1x256xi1> to vector<1x256xi1>
    %32 = vector.broadcast %31 : vector<1x256xi1> to vector<4x256xi1>
    %33 = vector.broadcast %cst_8 : f32 to vector<4x256xf32>
    %34 = arith.select %32, %21, %33 : vector<4x256xi1>, vector<4x256xf32>
    %c0_9 = arith.constant 0 : index
    %c0_10 = arith.constant 0 : index
    %35 = vector.load %arg16[%c0_9, %c0_10] : memref<36x256xf32, #tpu.memory_space<vmem>>, vector<4x256xf32>
    tpu.vector_store %arg16[%c0_9, %c0_10], %34 {strides = array<i32>} : memref<36x256xf32, #tpu.memory_space<vmem>>, vector<4x256xf32>,
    %cst_11 = arith.constant 0.000000e+00 : f32
    %36 = vector.broadcast %cst_11 : f32 to vector<4x64xf32>
    %37 = vector.extract_strided_slice %1 {offsets = [0, 0], sizes = [4, 192], strides = [1, 1]} : vector<4x256xf32> to vector<4x192xf32>
    %38 = tpu.concatenate %36, %37 in 1 : vector<4x64xf32>, vector<4x192xf32> -> vector<4x256xf32>
    %c4 = arith.constant 4 : index
    %c0_12 = arith.constant 0 : index
    %39 = vector.load %arg16[%c4, %c0_12] : memref<36x256xf32, #tpu.memory_space<vmem>>, vector<4x256xf32>
    tpu.vector_store %arg16[%c4, %c0_12], %38 {strides = array<i32>} : memref<36x256xf32, #tpu.memory_space<vmem>>, vector<4x256xf32>,
    %cst_13 = arith.constant 0.000000e+00 : f32
    %40 = vector.broadcast %cst_13 : f32 to vector<4x60xf32>
    %41 = vector.extract_strided_slice %1 {offsets = [0, 0], sizes = [4, 196], strides = [1, 1]} : vector<4x256xf32> to vector<4x196xf32>
    %42 = tpu.concatenate %40, %41 in 1 : vector<4x60xf32>, vector<4x196xf32> -> vector<4x256xf32>
    %c4_i32 = arith.constant 4 : i32
    %43 = vector.broadcast %c4_i32 : i32 to vector<1x256xi32>
    %44 = arith.addi %18, %43 : vector<1x256xi32>
    %c0_i32_14 = arith.constant 0 : i32
    %45 = vector.broadcast %c0_i32_14 : i32 to vector<1x256xi32>
    %46 = arith.cmpi sge, %44, %45 : vector<1x256xi32>
    %c4_i32_15 = arith.constant 4 : i32
    %47 = vector.broadcast %c4_i32_15 : i32 to vector<1x256xi32>
    %48 = arith.addi %18, %47 : vector<1x256xi32>
    %c16_i32_16 = arith.constant 16 : i32
    %49 = vector.broadcast %c16_i32_16 : i32 to vector<1x256xi32>
    %50 = arith.cmpi slt, %48, %49 : vector<1x256xi32>
    %51 = arith.andi %46, %50 : vector<1x256xi1>
    %cst_17 = arith.constant 0.000000e+00 : f32
    %52 = vector.shape_cast %51 : vector<1x256xi1> to vector<1x256xi1>
    %53 = vector.broadcast %52 : vector<1x256xi1> to vector<4x256xi1>
    %54 = vector.broadcast %cst_17 : f32 to vector<4x256xf32>
    %55 = arith.select %53, %42, %54 : vector<4x256xi1>, vector<4x256xf32>
    %c8 = arith.constant 8 : index
    %c0_18 = arith.constant 0 : index
    %56 = vector.load %arg16[%c8, %c0_18] : memref<36x256xf32, #tpu.memory_space<vmem>>, vector<4x256xf32>
    tpu.vector_store %arg16[%c8, %c0_18], %55 {strides = array<i32>} : memref<36x256xf32, #tpu.memory_space<vmem>>, vector<4x256xf32>,
    %cst_19 = arith.constant 0.000000e+00 : f32
    %57 = vector.broadcast %cst_19 : f32 to vector<4x4xf32>
    %58 = vector.extract_strided_slice %1 {offsets = [0, 0], sizes = [4, 252], strides = [1, 1]} : vector<4x256xf32> to vector<4x252xf32>
    %59 = tpu.concatenate %57, %58 in 1 : vector<4x4xf32>, vector<4x252xf32> -> vector<4x256xf32>
    %c-4_i32_20 = arith.constant -4 : i32
    %60 = vector.broadcast %c-4_i32_20 : i32 to vector<1x256xi32>
    %61 = arith.addi %18, %60 : vector<1x256xi32>
    %c0_i32_21 = arith.constant 0 : i32
    %62 = vector.broadcast %c0_i32_21 : i32 to vector<1x256xi32>
    %63 = arith.cmpi sge, %61, %62 : vector<1x256xi32>
    %c-4_i32_22 = arith.constant -4 : i32
    %64 = vector.broadcast %c-4_i32_22 : i32 to vector<1x256xi32>
    %65 = arith.addi %18, %64 : vector<1x256xi32>
    %c16_i32_23 = arith.constant 16 : i32
    %66 = vector.broadcast %c16_i32_23 : i32 to vector<1x256xi32>
    %67 = arith.cmpi slt, %65, %66 : vector<1x256xi32>
    %68 = arith.andi %63, %67 : vector<1x256xi1>
    %cst_24 = arith.constant 0.000000e+00 : f32
    %69 = vector.shape_cast %68 : vector<1x256xi1> to vector<1x256xi1>
    %70 = vector.broadcast %69 : vector<1x256xi1> to vector<4x256xi1>
    %71 = vector.broadcast %cst_24 : f32 to vector<4x256xf32>
    %72 = arith.select %70, %59, %71 : vector<4x256xi1>, vector<4x256xf32>
    %c12 = arith.constant 12 : index
    %c0_25 = arith.constant 0 : index
    %73 = vector.load %arg16[%c12, %c0_25] : memref<36x256xf32, #tpu.memory_space<vmem>>, vector<4x256xf32>
    tpu.vector_store %arg16[%c12, %c0_25], %72 {strides = array<i32>} : memref<36x256xf32, #tpu.memory_space<vmem>>, vector<4x256xf32>,
    %c16 = arith.constant 16 : index
    %c0_26 = arith.constant 0 : index
    %74 = vector.load %arg16[%c16, %c0_26] : memref<36x256xf32, #tpu.memory_space<vmem>>, vector<4x256xf32>
    tpu.vector_store %arg16[%c16, %c0_26], %1 {strides = array<i32>} : memref<36x256xf32, #tpu.memory_space<vmem>>, vector<4x256xf32>,
    %75 = vector.extract_strided_slice %1 {offsets = [0, 4], sizes = [4, 252], strides = [1, 1]} : vector<4x256xf32> to vector<4x252xf32>
    %cst_27 = arith.constant 0.000000e+00 : f32
    %76 = vector.broadcast %cst_27 : f32 to vector<4x4xf32>
    %77 = tpu.concatenate %75, %76 in 1 : vector<4x252xf32>, vector<4x4xf32> -> vector<4x256xf32>
    %c4_i32_28 = arith.constant 4 : i32
    %78 = vector.broadcast %c4_i32_28 : i32 to vector<1x256xi32>
    %79 = arith.addi %18, %78 : vector<1x256xi32>
    %c0_i32_29 = arith.constant 0 : i32
    %80 = vector.broadcast %c0_i32_29 : i32 to vector<1x256xi32>
    %81 = arith.cmpi sge, %79, %80 : vector<1x256xi32>
    %c4_i32_30 = arith.constant 4 : i32
    %82 = vector.broadcast %c4_i32_30 : i32 to vector<1x256xi32>
    %83 = arith.addi %18, %82 : vector<1x256xi32>
    %c16_i32_31 = arith.constant 16 : i32
    %84 = vector.broadcast %c16_i32_31 : i32 to vector<1x256xi32>
    %85 = arith.cmpi slt, %83, %84 : vector<1x256xi32>
    %86 = arith.andi %81, %85 : vector<1x256xi1>
    %cst_32 = arith.constant 0.000000e+00 : f32
    %87 = vector.shape_cast %86 : vector<1x256xi1> to vector<1x256xi1>
    %88 = vector.broadcast %87 : vector<1x256xi1> to vector<4x256xi1>
    %89 = vector.broadcast %cst_32 : f32 to vector<4x256xf32>
    %90 = arith.select %88, %77, %89 : vector<4x256xi1>, vector<4x256xf32>
    %c20 = arith.constant 20 : index
    %c0_33 = arith.constant 0 : index
    %91 = vector.load %arg16[%c20, %c0_33] : memref<36x256xf32, #tpu.memory_space<vmem>>, vector<4x256xf32>
    tpu.vector_store %arg16[%c20, %c0_33], %90 {strides = array<i32>} : memref<36x256xf32, #tpu.memory_space<vmem>>, vector<4x256xf32>,
    %92 = vector.extract_strided_slice %1 {offsets = [0, 60], sizes = [4, 196], strides = [1, 1]} : vector<4x256xf32> to vector<4x196xf32>
    %cst_34 = arith.constant 0.000000e+00 : f32
    %93 = vector.broadcast %cst_34 : f32 to vector<4x60xf32>
    %94 = tpu.concatenate %92, %93 in 1 : vector<4x196xf32>, vector<4x60xf32> -> vector<4x256xf32>
    %c-4_i32_35 = arith.constant -4 : i32
    %95 = vector.broadcast %c-4_i32_35 : i32 to vector<1x256xi32>
    %96 = arith.addi %18, %95 : vector<1x256xi32>
    %c0_i32_36 = arith.constant 0 : i32
    %97 = vector.broadcast %c0_i32_36 : i32 to vector<1x256xi32>
    %98 = arith.cmpi sge, %96, %97 : vector<1x256xi32>
    %c-4_i32_37 = arith.constant -4 : i32
    %99 = vector.broadcast %c-4_i32_37 : i32 to vector<1x256xi32>
    %100 = arith.addi %18, %99 : vector<1x256xi32>
    %c16_i32_38 = arith.constant 16 : i32
    %101 = vector.broadcast %c16_i32_38 : i32 to vector<1x256xi32>
    %102 = arith.cmpi slt, %100, %101 : vector<1x256xi32>
    %103 = arith.andi %98, %102 : vector<1x256xi1>
    %cst_39 = arith.constant 0.000000e+00 : f32
    %104 = vector.shape_cast %103 : vector<1x256xi1> to vector<1x256xi1>
    %105 = vector.broadcast %104 : vector<1x256xi1> to vector<4x256xi1>
    %106 = vector.broadcast %cst_39 : f32 to vector<4x256xf32>
    %107 = arith.select %105, %94, %106 : vector<4x256xi1>, vector<4x256xf32>
    %c24 = arith.constant 24 : index
    %c0_40 = arith.constant 0 : index
    %108 = vector.load %arg16[%c24, %c0_40] : memref<36x256xf32, #tpu.memory_space<vmem>>, vector<4x256xf32>
    tpu.vector_store %arg16[%c24, %c0_40], %107 {strides = array<i32>} : memref<36x256xf32, #tpu.memory_space<vmem>>, vector<4x256xf32>,
    %109 = vector.extract_strided_slice %1 {offsets = [0, 64], sizes = [4, 192], strides = [1, 1]} : vector<4x256xf32> to vector<4x192xf32>
    %cst_41 = arith.constant 0.000000e+00 : f32
    %110 = vector.broadcast %cst_41 : f32 to vector<4x64xf32>
    %111 = tpu.concatenate %109, %110 in 1 : vector<4x192xf32>, vector<4x64xf32> -> vector<4x256xf32>
    %c28 = arith.constant 28 : index
    %c0_42 = arith.constant 0 : index
    %112 = vector.load %arg16[%c28, %c0_42] : memref<36x256xf32, #tpu.memory_space<vmem>>, vector<4x256xf32>
    tpu.vector_store %arg16[%c28, %c0_42], %111 {strides = array<i32>} : memref<36x256xf32, #tpu.memory_space<vmem>>, vector<4x256xf32>,
    %113 = vector.extract_strided_slice %1 {offsets = [0, 68], sizes = [4, 188], strides = [1, 1]} : vector<4x256xf32> to vector<4x188xf32>
    %cst_43 = arith.constant 0.000000e+00 : f32
    %114 = vector.broadcast %cst_43 : f32 to vector<4x68xf32>
    %115 = tpu.concatenate %113, %114 in 1 : vector<4x188xf32>, vector<4x68xf32> -> vector<4x256xf32>
    %c4_i32_44 = arith.constant 4 : i32
    %116 = vector.broadcast %c4_i32_44 : i32 to vector<1x256xi32>
    %117 = arith.addi %18, %116 : vector<1x256xi32>
    %c0_i32_45 = arith.constant 0 : i32
    %118 = vector.broadcast %c0_i32_45 : i32 to vector<1x256xi32>
    %119 = arith.cmpi sge, %117, %118 : vector<1x256xi32>
    %c4_i32_46 = arith.constant 4 : i32
    %120 = vector.broadcast %c4_i32_46 : i32 to vector<1x256xi32>
    %121 = arith.addi %18, %120 : vector<1x256xi32>
    %c16_i32_47 = arith.constant 16 : i32
    %122 = vector.broadcast %c16_i32_47 : i32 to vector<1x256xi32>
    %123 = arith.cmpi slt, %121, %122 : vector<1x256xi32>
    %124 = arith.andi %119, %123 : vector<1x256xi1>
    %cst_48 = arith.constant 0.000000e+00 : f32
    %125 = vector.shape_cast %124 : vector<1x256xi1> to vector<1x256xi1>
    %126 = vector.broadcast %125 : vector<1x256xi1> to vector<4x256xi1>
    %127 = vector.broadcast %cst_48 : f32 to vector<4x256xf32>
    %128 = arith.select %126, %115, %127 : vector<4x256xi1>, vector<4x256xf32>
    %c32 = arith.constant 32 : index
    %c0_49 = arith.constant 0 : index
    %129 = vector.load %arg16[%c32, %c0_49] : memref<36x256xf32, #tpu.memory_space<vmem>>, vector<4x256xf32>
    tpu.vector_store %arg16[%c32, %c0_49], %128 {strides = array<i32>} : memref<36x256xf32, #tpu.memory_space<vmem>>, vector<4x256xf32>,
    %c0_50 = arith.constant 0 : index
    %c0_51 = arith.constant 0 : index
    %130 = vector.load %arg2[%c0_50, %c0_51] : memref<16x36xf32, #tpu.memory_space<vmem>>, vector<16x36xf32>
    %c0_52 = arith.constant 0 : index
    %c0_53 = arith.constant 0 : index
    %131 = vector.load %arg16[%c0_52, %c0_53] : memref<36x256xf32, #tpu.memory_space<vmem>>, vector<36x256xf32>
    %cst_54 = arith.constant dense<0.000000e+00> : vector<16x256xf32>
    %132 = tpu.matmul %130, %131, %cst_54 {dimension_numbers = #tpu.dot_dimension_numbers<[1], [0], [0], [1], [0, 0, 1, 1], [], []>} : vector<16x36xf32>, vector<36x256xf32>, vector<16x256xf32> -> vector<16x256xf32>
    %c0_55 = arith.constant 0 : index
    %c0_56 = arith.constant 0 : index
    %133 = vector.load %arg3[%c0_55, %c0_56] : memref<16x1xf32, #tpu.memory_space<vmem>>, vector<16x1xf32>
    %134 = vector.broadcast %133 : vector<16x1xf32> to vector<16x256xf32>
    %135 = arith.addf %132, %134 : vector<16x256xf32>
    %cst_57 = arith.constant 0.000000e+00 : f32
    %136 = vector.broadcast %cst_57 : f32 to vector<16x256xf32>
    %137 = arith.cmpf ogt, %135, %136 : vector<16x256xf32>
    %c0_58 = arith.constant 0 : index
    %c0_59 = arith.constant 0 : index
    %138 = vector.load %arg4[%c0_58, %c0_59] : memref<16x1xf32, #tpu.memory_space<vmem>>, vector<16x1xf32>
    %139 = vector.broadcast %138 : vector<16x1xf32> to vector<16x256xf32>
    %140 = arith.mulf %139, %135 : vector<16x256xf32>
    %141 = arith.select %137, %135, %140 : vector<16x256xi1>, vector<16x256xf32>
    %c0_60 = arith.constant 0 : index
    %c0_61 = arith.constant 0 : index
    %142 = vector.load %arg5[%c0_60, %c0_61] : memref<16x16xf32, #tpu.memory_space<vmem>>, vector<16x16xf32>
    %cst_62 = arith.constant dense<0.000000e+00> : vector<16x256xf32>
    %143 = tpu.matmul %142, %141, %cst_62 {dimension_numbers = #tpu.dot_dimension_numbers<[1], [0], [0], [1], [0, 0, 1, 1], [], []>} : vector<16x16xf32>, vector<16x256xf32>, vector<16x256xf32> -> vector<16x256xf32>
    %c0_63 = arith.constant 0 : index
    %c0_64 = arith.constant 0 : index
    %144 = vector.load %arg6[%c0_63, %c0_64] : memref<16x1xf32, #tpu.memory_space<vmem>>, vector<16x1xf32>
    %145 = vector.broadcast %144 : vector<16x1xf32> to vector<16x256xf32>
    %146 = arith.addf %143, %145 : vector<16x256xf32>
    %cst_65 = arith.constant 0.000000e+00 : f32
    %147 = vector.broadcast %cst_65 : f32 to vector<16x256xf32>
    %148 = arith.cmpf ogt, %146, %147 : vector<16x256xf32>
    %c0_66 = arith.constant 0 : index
    %c0_67 = arith.constant 0 : index
    %149 = vector.load %arg7[%c0_66, %c0_67] : memref<16x1xf32, #tpu.memory_space<vmem>>, vector<16x1xf32>
    %150 = vector.broadcast %149 : vector<16x1xf32> to vector<16x256xf32>
    %151 = arith.mulf %150, %146 : vector<16x256xf32>
    %152 = arith.select %148, %146, %151 : vector<16x256xi1>, vector<16x256xf32>
    %153 = vector.extract_strided_slice %152 {offsets = [12, 0], sizes = [4, 256], strides = [1, 1]} : vector<16x256xf32> to vector<4x256xf32>
    %cst_68 = arith.constant 0.000000e+00 : f32
    %154 = vector.broadcast %cst_68 : f32 to vector<4x17xf32>
    %155 = vector.extract_strided_slice %153 {offsets = [0, 0], sizes = [4, 239], strides = [1, 1]} : vector<4x256xf32> to vector<4x239xf32>
    %156 = tpu.concatenate %154, %155 in 1 : vector<4x17xf32>, vector<4x239xf32> -> vector<4x256xf32>
    %c-1_i32 = arith.constant -1 : i32
    %157 = vector.broadcast %c-1_i32 : i32 to vector<1x256xi32>
    %158 = arith.addi %18, %157 : vector<1x256xi32>
    %c0_i32_69 = arith.constant 0 : i32
    %159 = vector.broadcast %c0_i32_69 : i32 to vector<1x256xi32>
    %160 = arith.cmpi sge, %158, %159 : vector<1x256xi32>
    %c-1_i32_70 = arith.constant -1 : i32
    %161 = vector.broadcast %c-1_i32_70 : i32 to vector<1x256xi32>
    %162 = arith.addi %18, %161 : vector<1x256xi32>
    %c16_i32_71 = arith.constant 16 : i32
    %163 = vector.broadcast %c16_i32_71 : i32 to vector<1x256xi32>
    %164 = arith.cmpi slt, %162, %163 : vector<1x256xi32>
    %165 = arith.andi %160, %164 : vector<1x256xi1>
    %cst_72 = arith.constant 0.000000e+00 : f32
    %166 = vector.shape_cast %165 : vector<1x256xi1> to vector<1x256xi1>
    %167 = vector.broadcast %166 : vector<1x256xi1> to vector<4x256xi1>
    %168 = vector.broadcast %cst_72 : f32 to vector<4x256xf32>
    %169 = arith.select %167, %156, %168 : vector<4x256xi1>, vector<4x256xf32>
    %c0_73 = arith.constant 0 : index
    %c0_74 = arith.constant 0 : index
    %170 = vector.load %arg17[%c0_73, %c0_74] : memref<36x1024xf32, #tpu.memory_space<vmem>>, vector<4x256xf32>
    tpu.vector_store %arg17[%c0_73, %c0_74], %169 {strides = array<i32>} : memref<36x1024xf32, #tpu.memory_space<vmem>>, vector<4x256xf32>,
    %171 = vector.extract_strided_slice %152 {offsets = [8, 0], sizes = [4, 256], strides = [1, 1]} : vector<16x256xf32> to vector<4x256xf32>
    %cst_75 = arith.constant 0.000000e+00 : f32
    %172 = vector.broadcast %cst_75 : f32 to vector<4x16xf32>
    %173 = vector.extract_strided_slice %171 {offsets = [0, 0], sizes = [4, 240], strides = [1, 1]} : vector<4x256xf32> to vector<4x240xf32>
    %174 = tpu.concatenate %172, %173 in 1 : vector<4x16xf32>, vector<4x240xf32> -> vector<4x256xf32>
    %c4_76 = arith.constant 4 : index
    %c0_77 = arith.constant 0 : index
    %175 = vector.load %arg17[%c4_76, %c0_77] : memref<36x1024xf32, #tpu.memory_space<vmem>>, vector<4x256xf32>
    tpu.vector_store %arg17[%c4_76, %c0_77], %174 {strides = array<i32>} : memref<36x1024xf32, #tpu.memory_space<vmem>>, vector<4x256xf32>,
    %176 = vector.extract_strided_slice %152 {offsets = [12, 0], sizes = [4, 256], strides = [1, 1]} : vector<16x256xf32> to vector<4x256xf32>
    %cst_78 = arith.constant 0.000000e+00 : f32
    %177 = vector.broadcast %cst_78 : f32 to vector<4x16xf32>
    %178 = vector.extract_strided_slice %176 {offsets = [0, 0], sizes = [4, 240], strides = [1, 1]} : vector<4x256xf32> to vector<4x240xf32>
    %179 = tpu.concatenate %177, %178 in 1 : vector<4x16xf32>, vector<4x240xf32> -> vector<4x256xf32>
    %c8_79 = arith.constant 8 : index
    %c0_80 = arith.constant 0 : index
    %180 = vector.load %arg17[%c8_79, %c0_80] : memref<36x1024xf32, #tpu.memory_space<vmem>>, vector<4x256xf32>
    tpu.vector_store %arg17[%c8_79, %c0_80], %179 {strides = array<i32>} : memref<36x1024xf32, #tpu.memory_space<vmem>>, vector<4x256xf32>,
    %181 = vector.extract_strided_slice %152 {offsets = [4, 0], sizes = [4, 256], strides = [1, 1]} : vector<16x256xf32> to vector<4x256xf32>
    %cst_81 = arith.constant 0.000000e+00 : f32
    %182 = vector.broadcast %cst_81 : f32 to vector<4x1xf32>
    %183 = vector.extract_strided_slice %181 {offsets = [0, 0], sizes = [4, 255], strides = [1, 1]} : vector<4x256xf32> to vector<4x255xf32>
    %184 = tpu.concatenate %182, %183 in 1 : vector<4x1xf32>, vector<4x255xf32> -> vector<4x256xf32>
    %c-1_i32_82 = arith.constant -1 : i32
    %185 = vector.broadcast %c-1_i32_82 : i32 to vector<1x256xi32>
    %186 = arith.addi %18, %185 : vector<1x256xi32>
    %c0_i32_83 = arith.constant 0 : i32
    %187 = vector.broadcast %c0_i32_83 : i32 to vector<1x256xi32>
    %188 = arith.cmpi sge, %186, %187 : vector<1x256xi32>
    %c-1_i32_84 = arith.constant -1 : i32
    %189 = vector.broadcast %c-1_i32_84 : i32 to vector<1x256xi32>
    %190 = arith.addi %18, %189 : vector<1x256xi32>
    %c16_i32_85 = arith.constant 16 : i32
    %191 = vector.broadcast %c16_i32_85 : i32 to vector<1x256xi32>
    %192 = arith.cmpi slt, %190, %191 : vector<1x256xi32>
    %193 = arith.andi %188, %192 : vector<1x256xi1>
    %cst_86 = arith.constant 0.000000e+00 : f32
    %194 = vector.shape_cast %193 : vector<1x256xi1> to vector<1x256xi1>
    %195 = vector.broadcast %194 : vector<1x256xi1> to vector<4x256xi1>
    %196 = vector.broadcast %cst_86 : f32 to vector<4x256xf32>
    %197 = arith.select %195, %184, %196 : vector<4x256xi1>, vector<4x256xf32>
    %c12_87 = arith.constant 12 : index
    %c0_88 = arith.constant 0 : index
    %198 = vector.load %arg17[%c12_87, %c0_88] : memref<36x1024xf32, #tpu.memory_space<vmem>>, vector<4x256xf32>
    tpu.vector_store %arg17[%c12_87, %c0_88], %197 {strides = array<i32>} : memref<36x1024xf32, #tpu.memory_space<vmem>>, vector<4x256xf32>,
    %199 = vector.extract_strided_slice %152 {offsets = [0, 0], sizes = [4, 256], strides = [1, 1]} : vector<16x256xf32> to vector<4x256xf32>
    %c16_89 = arith.constant 16 : index
    %c0_90 = arith.constant 0 : index
    %200 = vector.load %arg17[%c16_89, %c0_90] : memref<36x1024xf32, #tpu.memory_space<vmem>>, vector<4x256xf32>
    tpu.vector_store %arg17[%c16_89, %c0_90], %199 {strides = array<i32>} : memref<36x1024xf32, #tpu.memory_space<vmem>>, vector<4x256xf32>,
    %201 = vector.extract_strided_slice %152 {offsets = [4, 0], sizes = [4, 256], strides = [1, 1]} : vector<16x256xf32> to vector<4x256xf32>
    %c20_91 = arith.constant 20 : index
    %c0_92 = arith.constant 0 : index
    %202 = vector.load %arg17[%c20_91, %c0_92] : memref<36x1024xf32, #tpu.memory_space<vmem>>, vector<4x256xf32>
    tpu.vector_store %arg17[%c20_91, %c0_92], %201 {strides = array<i32>} : memref<36x1024xf32, #tpu.memory_space<vmem>>, vector<4x256xf32>,
    %203 = vector.extract_strided_slice %152 {offsets = [12, 0], sizes = [4, 256], strides = [1, 1]} : vector<16x256xf32> to vector<4x256xf32>
    %cst_93 = arith.constant 0.000000e+00 : f32
    %204 = vector.broadcast %cst_93 : f32 to vector<4x1xf32>
    %205 = vector.extract_strided_slice %203 {offsets = [0, 0], sizes = [4, 255], strides = [1, 1]} : vector<4x256xf32> to vector<4x255xf32>
    %206 = tpu.concatenate %204, %205 in 1 : vector<4x1xf32>, vector<4x255xf32> -> vector<4x256xf32>
    %c-1_i32_94 = arith.constant -1 : i32
    %207 = vector.broadcast %c-1_i32_94 : i32 to vector<1x256xi32>
    %208 = arith.addi %18, %207 : vector<1x256xi32>
    %c0_i32_95 = arith.constant 0 : i32
    %209 = vector.broadcast %c0_i32_95 : i32 to vector<1x256xi32>
    %210 = arith.cmpi sge, %208, %209 : vector<1x256xi32>
    %c-1_i32_96 = arith.constant -1 : i32
    %211 = vector.broadcast %c-1_i32_96 : i32 to vector<1x256xi32>
    %212 = arith.addi %18, %211 : vector<1x256xi32>
    %c16_i32_97 = arith.constant 16 : i32
    %213 = vector.broadcast %c16_i32_97 : i32 to vector<1x256xi32>
    %214 = arith.cmpi slt, %212, %213 : vector<1x256xi32>
    %215 = arith.andi %210, %214 : vector<1x256xi1>
    %cst_98 = arith.constant 0.000000e+00 : f32
    %216 = vector.shape_cast %215 : vector<1x256xi1> to vector<1x256xi1>
    %217 = vector.broadcast %216 : vector<1x256xi1> to vector<4x256xi1>
    %218 = vector.broadcast %cst_98 : f32 to vector<4x256xf32>
    %219 = arith.select %217, %206, %218 : vector<4x256xi1>, vector<4x256xf32>
    %c24_99 = arith.constant 24 : index
    %c0_100 = arith.constant 0 : index
    %220 = vector.load %arg17[%c24_99, %c0_100] : memref<36x1024xf32, #tpu.memory_space<vmem>>, vector<4x256xf32>
    tpu.vector_store %arg17[%c24_99, %c0_100], %219 {strides = array<i32>} : memref<36x1024xf32, #tpu.memory_space<vmem>>, vector<4x256xf32>,
    %221 = vector.extract_strided_slice %152 {offsets = [8, 0], sizes = [4, 256], strides = [1, 1]} : vector<16x256xf32> to vector<4x256xf32>
    %c28_101 = arith.constant 28 : index
    %c0_102 = arith.constant 0 : index
    %222 = vector.load %arg17[%c28_101, %c0_102] : memref<36x1024xf32, #tpu.memory_space<vmem>>, vector<4x256xf32>
    tpu.vector_store %arg17[%c28_101, %c0_102], %221 {strides = array<i32>} : memref<36x1024xf32, #tpu.memory_space<vmem>>, vector<4x256xf32>,
    %223 = vector.extract_strided_slice %152 {offsets = [12, 0], sizes = [4, 256], strides = [1, 1]} : vector<16x256xf32> to vector<4x256xf32>
    %c32_103 = arith.constant 32 : index
    %c0_104 = arith.constant 0 : index
    %224 = vector.load %arg17[%c32_103, %c0_104] : memref<36x1024xf32, #tpu.memory_space<vmem>>, vector<4x256xf32>
    tpu.vector_store %arg17[%c32_103, %c0_104], %223 {strides = array<i32>} : memref<36x1024xf32, #tpu.memory_space<vmem>>, vector<4x256xf32>,
    %c0_105 = arith.constant 0 : index
    %c256 = arith.constant 256 : index
    %225 = vector.load %arg17[%c0_105, %c256] : memref<36x1024xf32, #tpu.memory_space<vmem>>, vector<4x256xf32>
    tpu.vector_store %arg17[%c0_105, %c256], %174 {strides = array<i32>} : memref<36x1024xf32, #tpu.memory_space<vmem>>, vector<4x256xf32>,
    %c4_106 = arith.constant 4 : index
    %c256_107 = arith.constant 256 : index
    %226 = vector.load %arg17[%c4_106, %c256_107] : memref<36x1024xf32, #tpu.memory_space<vmem>>, vector<4x256xf32>
    tpu.vector_store %arg17[%c4_106, %c256_107], %179 {strides = array<i32>} : memref<36x1024xf32, #tpu.memory_space<vmem>>, vector<4x256xf32>,
    %227 = vector.extract_strided_slice %152 {offsets = [8, 0], sizes = [4, 256], strides = [1, 1]} : vector<16x256xf32> to vector<4x256xf32>
    %cst_108 = arith.constant 0.000000e+00 : f32
    %228 = vector.broadcast %cst_108 : f32 to vector<4x15xf32>
    %229 = vector.extract_strided_slice %227 {offsets = [0, 0], sizes = [4, 241], strides = [1, 1]} : vector<4x256xf32> to vector<4x241xf32>
    %230 = tpu.concatenate %228, %229 in 1 : vector<4x15xf32>, vector<4x241xf32> -> vector<4x256xf32>
    %c1_i32_109 = arith.constant 1 : i32
    %231 = vector.broadcast %c1_i32_109 : i32 to vector<1x256xi32>
    %232 = arith.addi %18, %231 : vector<1x256xi32>
    %c0_i32_110 = arith.constant 0 : i32
    %233 = vector.broadcast %c0_i32_110 : i32 to vector<1x256xi32>
    %234 = arith.cmpi sge, %232, %233 : vector<1x256xi32>
    %c1_i32_111 = arith.constant 1 : i32
    %235 = vector.broadcast %c1_i32_111 : i32 to vector<1x256xi32>
    %236 = arith.addi %18, %235 : vector<1x256xi32>
    %c16_i32_112 = arith.constant 16 : i32
    %237 = vector.broadcast %c16_i32_112 : i32 to vector<1x256xi32>
    %238 = arith.cmpi slt, %236, %237 : vector<1x256xi32>
    %239 = arith.andi %234, %238 : vector<1x256xi1>
    %cst_113 = arith.constant 0.000000e+00 : f32
    %240 = vector.shape_cast %239 : vector<1x256xi1> to vector<1x256xi1>
    %241 = vector.broadcast %240 : vector<1x256xi1> to vector<4x256xi1>
    %242 = vector.broadcast %cst_113 : f32 to vector<4x256xf32>
    %243 = arith.select %241, %230, %242 : vector<4x256xi1>, vector<4x256xf32>
    %c8_114 = arith.constant 8 : index
    %c256_115 = arith.constant 256 : index
    %244 = vector.load %arg17[%c8_114, %c256_115] : memref<36x1024xf32, #tpu.memory_space<vmem>>, vector<4x256xf32>
    tpu.vector_store %arg17[%c8_114, %c256_115], %243 {strides = array<i32>} : memref<36x1024xf32, #tpu.memory_space<vmem>>, vector<4x256xf32>,
    %c12_116 = arith.constant 12 : index
    %c256_117 = arith.constant 256 : index
    %245 = vector.load %arg17[%c12_116, %c256_117] : memref<36x1024xf32, #tpu.memory_space<vmem>>, vector<4x256xf32>
    tpu.vector_store %arg17[%c12_116, %c256_117], %199 {strides = array<i32>} : memref<36x1024xf32, #tpu.memory_space<vmem>>, vector<4x256xf32>,
    %c16_118 = arith.constant 16 : index
    %c256_119 = arith.constant 256 : index
    %246 = vector.load %arg17[%c16_118, %c256_119] : memref<36x1024xf32, #tpu.memory_space<vmem>>, vector<4x256xf32>
    tpu.vector_store %arg17[%c16_118, %c256_119], %201 {strides = array<i32>} : memref<36x1024xf32, #tpu.memory_space<vmem>>, vector<4x256xf32>,
    %247 = vector.extract_strided_slice %152 {offsets = [0, 0], sizes = [4, 256], strides = [1, 1]} : vector<16x256xf32> to vector<4x256xf32>
    %248 = vector.extract_strided_slice %247 {offsets = [0, 1], sizes = [4, 255], strides = [1, 1]} : vector<4x256xf32> to vector<4x255xf32>
    %cst_120 = arith.constant 0.000000e+00 : f32
    %249 = vector.broadcast %cst_120 : f32 to vector<4x1xf32>
    %250 = tpu.concatenate %248, %249 in 1 : vector<4x255xf32>, vector<4x1xf32> -> vector<4x256xf32>
    %c1_i32_121 = arith.constant 1 : i32
    %251 = vector.broadcast %c1_i32_121 : i32 to vector<1x256xi32>
    %252 = arith.addi %18, %251 : vector<1x256xi32>
    %c0_i32_122 = arith.constant 0 : i32
    %253 = vector.broadcast %c0_i32_122 : i32 to vector<1x256xi32>
    %254 = arith.cmpi sge, %252, %253 : vector<1x256xi32>
    %c1_i32_123 = arith.constant 1 : i32
    %255 = vector.broadcast %c1_i32_123 : i32 to vector<1x256xi32>
    %256 = arith.addi %18, %255 : vector<1x256xi32>
    %c16_i32_124 = arith.constant 16 : i32
    %257 = vector.broadcast %c16_i32_124 : i32 to vector<1x256xi32>
    %258 = arith.cmpi slt, %256, %257 : vector<1x256xi32>
    %259 = arith.andi %254, %258 : vector<1x256xi1>
    %cst_125 = arith.constant 0.000000e+00 : f32
    %260 = vector.shape_cast %259 : vector<1x256xi1> to vector<1x256xi1>
    %261 = vector.broadcast %260 : vector<1x256xi1> to vector<4x256xi1>
    %262 = vector.broadcast %cst_125 : f32 to vector<4x256xf32>
    %263 = arith.select %261, %250, %262 : vector<4x256xi1>, vector<4x256xf32>
    %c20_126 = arith.constant 20 : index
    %c256_127 = arith.constant 256 : index
    %264 = vector.load %arg17[%c20_126, %c256_127] : memref<36x1024xf32, #tpu.memory_space<vmem>>, vector<4x256xf32>
    tpu.vector_store %arg17[%c20_126, %c256_127], %263 {strides = array<i32>} : memref<36x1024xf32, #tpu.memory_space<vmem>>, vector<4x256xf32>,
    %c24_128 = arith.constant 24 : index
    %c256_129 = arith.constant 256 : index
    %265 = vector.load %arg17[%c24_128, %c256_129] : memref<36x1024xf32, #tpu.memory_space<vmem>>, vector<4x256xf32>
    tpu.vector_store %arg17[%c24_128, %c256_129], %221 {strides = array<i32>} : memref<36x1024xf32, #tpu.memory_space<vmem>>, vector<4x256xf32>,
    %c28_130 = arith.constant 28 : index
    %c256_131 = arith.constant 256 : index
    %266 = vector.load %arg17[%c28_130, %c256_131] : memref<36x1024xf32, #tpu.memory_space<vmem>>, vector<4x256xf32>
    tpu.vector_store %arg17[%c28_130, %c256_131], %223 {strides = array<i32>} : memref<36x1024xf32, #tpu.memory_space<vmem>>, vector<4x256xf32>,
    %267 = vector.extract_strided_slice %152 {offsets = [8, 0], sizes = [4, 256], strides = [1, 1]} : vector<16x256xf32> to vector<4x256xf32>
    %268 = vector.extract_strided_slice %267 {offsets = [0, 1], sizes = [4, 255], strides = [1, 1]} : vector<4x256xf32> to vector<4x255xf32>
    %cst_132 = arith.constant 0.000000e+00 : f32
    %269 = vector.broadcast %cst_132 : f32 to vector<4x1xf32>
    %270 = tpu.concatenate %268, %269 in 1 : vector<4x255xf32>, vector<4x1xf32> -> vector<4x256xf32>
    %c1_i32_133 = arith.constant 1 : i32
    %271 = vector.broadcast %c1_i32_133 : i32 to vector<1x256xi32>
    %272 = arith.addi %18, %271 : vector<1x256xi32>
    %c0_i32_134 = arith.constant 0 : i32
    %273 = vector.broadcast %c0_i32_134 : i32 to vector<1x256xi32>
    %274 = arith.cmpi sge, %272, %273 : vector<1x256xi32>
    %c1_i32_135 = arith.constant 1 : i32
    %275 = vector.broadcast %c1_i32_135 : i32 to vector<1x256xi32>
    %276 = arith.addi %18, %275 : vector<1x256xi32>
    %c16_i32_136 = arith.constant 16 : i32
    %277 = vector.broadcast %c16_i32_136 : i32 to vector<1x256xi32>
    %278 = arith.cmpi slt, %276, %277 : vector<1x256xi32>
    %279 = arith.andi %274, %278 : vector<1x256xi1>
    %cst_137 = arith.constant 0.000000e+00 : f32
    %280 = vector.shape_cast %279 : vector<1x256xi1> to vector<1x256xi1>
    %281 = vector.broadcast %280 : vector<1x256xi1> to vector<4x256xi1>
    %282 = vector.broadcast %cst_137 : f32 to vector<4x256xf32>
    %283 = arith.select %281, %270, %282 : vector<4x256xi1>, vector<4x256xf32>
    %c32_138 = arith.constant 32 : index
    %c256_139 = arith.constant 256 : index
    %284 = vector.load %arg17[%c32_138, %c256_139] : memref<36x1024xf32, #tpu.memory_space<vmem>>, vector<4x256xf32>
    tpu.vector_store %arg17[%c32_138, %c256_139], %283 {strides = array<i32>} : memref<36x1024xf32, #tpu.memory_space<vmem>>, vector<4x256xf32>,
    %c0_140 = arith.constant 0 : index
    %c512 = arith.constant 512 : index
    %285 = vector.load %arg17[%c0_140, %c512] : memref<36x1024xf32, #tpu.memory_space<vmem>>, vector<4x256xf32>
    tpu.vector_store %arg17[%c0_140, %c512], %197 {strides = array<i32>} : memref<36x1024xf32, #tpu.memory_space<vmem>>, vector<4x256xf32>,
    %c4_141 = arith.constant 4 : index
    %c512_142 = arith.constant 512 : index
    %286 = vector.load %arg17[%c4_141, %c512_142] : memref<36x1024xf32, #tpu.memory_space<vmem>>, vector<4x256xf32>
    tpu.vector_store %arg17[%c4_141, %c512_142], %199 {strides = array<i32>} : memref<36x1024xf32, #tpu.memory_space<vmem>>, vector<4x256xf32>,
    %c8_143 = arith.constant 8 : index
    %c512_144 = arith.constant 512 : index
    %287 = vector.load %arg17[%c8_143, %c512_144] : memref<36x1024xf32, #tpu.memory_space<vmem>>, vector<4x256xf32>
    tpu.vector_store %arg17[%c8_143, %c512_144], %201 {strides = array<i32>} : memref<36x1024xf32, #tpu.memory_space<vmem>>, vector<4x256xf32>,
    %c12_145 = arith.constant 12 : index
    %c512_146 = arith.constant 512 : index
    %288 = vector.load %arg17[%c12_145, %c512_146] : memref<36x1024xf32, #tpu.memory_space<vmem>>, vector<4x256xf32>
    tpu.vector_store %arg17[%c12_145, %c512_146], %219 {strides = array<i32>} : memref<36x1024xf32, #tpu.memory_space<vmem>>, vector<4x256xf32>,
    %c16_147 = arith.constant 16 : index
    %c512_148 = arith.constant 512 : index
    %289 = vector.load %arg17[%c16_147, %c512_148] : memref<36x1024xf32, #tpu.memory_space<vmem>>, vector<4x256xf32>
    tpu.vector_store %arg17[%c16_147, %c512_148], %221 {strides = array<i32>} : memref<36x1024xf32, #tpu.memory_space<vmem>>, vector<4x256xf32>,
    %c20_149 = arith.constant 20 : index
    %c512_150 = arith.constant 512 : index
    %290 = vector.load %arg17[%c20_149, %c512_150] : memref<36x1024xf32, #tpu.memory_space<vmem>>, vector<4x256xf32>
    tpu.vector_store %arg17[%c20_149, %c512_150], %223 {strides = array<i32>} : memref<36x1024xf32, #tpu.memory_space<vmem>>, vector<4x256xf32>,
    %291 = vector.extract_strided_slice %152 {offsets = [4, 0], sizes = [4, 256], strides = [1, 1]} : vector<16x256xf32> to vector<4x256xf32>
    %292 = vector.extract_strided_slice %291 {offsets = [0, 15], sizes = [4, 241], strides = [1, 1]} : vector<4x256xf32> to vector<4x241xf32>
    %cst_151 = arith.constant 0.000000e+00 : f32
    %293 = vector.broadcast %cst_151 : f32 to vector<4x15xf32>
    %294 = tpu.concatenate %292, %293 in 1 : vector<4x241xf32>, vector<4x15xf32> -> vector<4x256xf32>
    %c-1_i32_152 = arith.constant -1 : i32
    %295 = vector.broadcast %c-1_i32_152 : i32 to vector<1x256xi32>
    %296 = arith.addi %18, %295 : vector<1x256xi32>
    %c0_i32_153 = arith.constant 0 : i32
    %297 = vector.broadcast %c0_i32_153 : i32 to vector<1x256xi32>
    %298 = arith.cmpi sge, %296, %297 : vector<1x256xi32>
    %c-1_i32_154 = arith.constant -1 : i32
    %299 = vector.broadcast %c-1_i32_154 : i32 to vector<1x256xi32>
    %300 = arith.addi %18, %299 : vector<1x256xi32>
    %c16_i32_155 = arith.constant 16 : i32
    %301 = vector.broadcast %c16_i32_155 : i32 to vector<1x256xi32>
    %302 = arith.cmpi slt, %300, %301 : vector<1x256xi32>
    %303 = arith.andi %298, %302 : vector<1x256xi1>
    %cst_156 = arith.constant 0.000000e+00 : f32
    %304 = vector.shape_cast %303 : vector<1x256xi1> to vector<1x256xi1>
    %305 = vector.broadcast %304 : vector<1x256xi1> to vector<4x256xi1>
    %306 = vector.broadcast %cst_156 : f32 to vector<4x256xf32>
    %307 = arith.select %305, %294, %306 : vector<4x256xi1>, vector<4x256xf32>
    %c24_157 = arith.constant 24 : index
    %c512_158 = arith.constant 512 : index
    %308 = vector.load %arg17[%c24_157, %c512_158] : memref<36x1024xf32, #tpu.memory_space<vmem>>, vector<4x256xf32>
    tpu.vector_store %arg17[%c24_157, %c512_158], %307 {strides = array<i32>} : memref<36x1024xf32, #tpu.memory_space<vmem>>, vector<4x256xf32>,
    %309 = vector.extract_strided_slice %152 {offsets = [0, 0], sizes = [4, 256], strides = [1, 1]} : vector<16x256xf32> to vector<4x256xf32>
    %310 = vector.extract_strided_slice %309 {offsets = [0, 16], sizes = [4, 240], strides = [1, 1]} : vector<4x256xf32> to vector<4x240xf32>
    %cst_159 = arith.constant 0.000000e+00 : f32
    %311 = vector.broadcast %cst_159 : f32 to vector<4x16xf32>
    %312 = tpu.concatenate %310, %311 in 1 : vector<4x240xf32>, vector<4x16xf32> -> vector<4x256xf32>
    %c28_160 = arith.constant 28 : index
    %c512_161 = arith.constant 512 : index
    %313 = vector.load %arg17[%c28_160, %c512_161] : memref<36x1024xf32, #tpu.memory_space<vmem>>, vector<4x256xf32>
    tpu.vector_store %arg17[%c28_160, %c512_161], %312 {strides = array<i32>} : memref<36x1024xf32, #tpu.memory_space<vmem>>, vector<4x256xf32>,
    %314 = vector.extract_strided_slice %152 {offsets = [4, 0], sizes = [4, 256], strides = [1, 1]} : vector<16x256xf32> to vector<4x256xf32>
    %315 = vector.extract_strided_slice %314 {offsets = [0, 16], sizes = [4, 240], strides = [1, 1]} : vector<4x256xf32> to vector<4x240xf32>
    %cst_162 = arith.constant 0.000000e+00 : f32
    %316 = vector.broadcast %cst_162 : f32 to vector<4x16xf32>
    %317 = tpu.concatenate %315, %316 in 1 : vector<4x240xf32>, vector<4x16xf32> -> vector<4x256xf32>
    %c32_163 = arith.constant 32 : index
    %c512_164 = arith.constant 512 : index
    %318 = vector.load %arg17[%c32_163, %c512_164] : memref<36x1024xf32, #tpu.memory_space<vmem>>, vector<4x256xf32>
    tpu.vector_store %arg17[%c32_163, %c512_164], %317 {strides = array<i32>} : memref<36x1024xf32, #tpu.memory_space<vmem>>, vector<4x256xf32>,
    %c0_165 = arith.constant 0 : index
    %c768 = arith.constant 768 : index
    %319 = vector.load %arg17[%c0_165, %c768] : memref<36x1024xf32, #tpu.memory_space<vmem>>, vector<4x256xf32>
    tpu.vector_store %arg17[%c0_165, %c768], %199 {strides = array<i32>} : memref<36x1024xf32, #tpu.memory_space<vmem>>, vector<4x256xf32>,
    %c4_166 = arith.constant 4 : index
    %c768_167 = arith.constant 768 : index
    %320 = vector.load %arg17[%c4_166, %c768_167] : memref<36x1024xf32, #tpu.memory_space<vmem>>, vector<4x256xf32>
    tpu.vector_store %arg17[%c4_166, %c768_167], %201 {strides = array<i32>} : memref<36x1024xf32, #tpu.memory_space<vmem>>, vector<4x256xf32>,
    %c8_168 = arith.constant 8 : index
    %c768_169 = arith.constant 768 : index
    %321 = vector.load %arg17[%c8_168, %c768_169] : memref<36x1024xf32, #tpu.memory_space<vmem>>, vector<4x256xf32>
    tpu.vector_store %arg17[%c8_168, %c768_169], %263 {strides = array<i32>} : memref<36x1024xf32, #tpu.memory_space<vmem>>, vector<4x256xf32>,
    %c12_170 = arith.constant 12 : index
    %c768_171 = arith.constant 768 : index
    %322 = vector.load %arg17[%c12_170, %c768_171] : memref<36x1024xf32, #tpu.memory_space<vmem>>, vector<4x256xf32>
    tpu.vector_store %arg17[%c12_170, %c768_171], %221 {strides = array<i32>} : memref<36x1024xf32, #tpu.memory_space<vmem>>, vector<4x256xf32>,
    %c16_172 = arith.constant 16 : index
    %c768_173 = arith.constant 768 : index
    %323 = vector.load %arg17[%c16_172, %c768_173] : memref<36x1024xf32, #tpu.memory_space<vmem>>, vector<4x256xf32>
    tpu.vector_store %arg17[%c16_172, %c768_173], %223 {strides = array<i32>} : memref<36x1024xf32, #tpu.memory_space<vmem>>, vector<4x256xf32>,
    %c20_174 = arith.constant 20 : index
    %c768_175 = arith.constant 768 : index
    %324 = vector.load %arg17[%c20_174, %c768_175] : memref<36x1024xf32, #tpu.memory_space<vmem>>, vector<4x256xf32>
    tpu.vector_store %arg17[%c20_174, %c768_175], %283 {strides = array<i32>} : memref<36x1024xf32, #tpu.memory_space<vmem>>, vector<4x256xf32>,
    %c24_176 = arith.constant 24 : index
    %c768_177 = arith.constant 768 : index
    %325 = vector.load %arg17[%c24_176, %c768_177] : memref<36x1024xf32, #tpu.memory_space<vmem>>, vector<4x256xf32>
    tpu.vector_store %arg17[%c24_176, %c768_177], %312 {strides = array<i32>} : memref<36x1024xf32, #tpu.memory_space<vmem>>, vector<4x256xf32>,
    %c28_178 = arith.constant 28 : index
    %c768_179 = arith.constant 768 : index
    %326 = vector.load %arg17[%c28_178, %c768_179] : memref<36x1024xf32, #tpu.memory_space<vmem>>, vector<4x256xf32>
    tpu.vector_store %arg17[%c28_178, %c768_179], %317 {strides = array<i32>} : memref<36x1024xf32, #tpu.memory_space<vmem>>, vector<4x256xf32>,
    %327 = vector.extract_strided_slice %152 {offsets = [0, 0], sizes = [4, 256], strides = [1, 1]} : vector<16x256xf32> to vector<4x256xf32>
    %328 = vector.extract_strided_slice %327 {offsets = [0, 17], sizes = [4, 239], strides = [1, 1]} : vector<4x256xf32> to vector<4x239xf32>
    %cst_180 = arith.constant 0.000000e+00 : f32
    %329 = vector.broadcast %cst_180 : f32 to vector<4x17xf32>
    %330 = tpu.concatenate %328, %329 in 1 : vector<4x239xf32>, vector<4x17xf32> -> vector<4x256xf32>
    %c1_i32_181 = arith.constant 1 : i32
    %331 = vector.broadcast %c1_i32_181 : i32 to vector<1x256xi32>
    %332 = arith.addi %18, %331 : vector<1x256xi32>
    %c0_i32_182 = arith.constant 0 : i32
    %333 = vector.broadcast %c0_i32_182 : i32 to vector<1x256xi32>
    %334 = arith.cmpi sge, %332, %333 : vector<1x256xi32>
    %c1_i32_183 = arith.constant 1 : i32
    %335 = vector.broadcast %c1_i32_183 : i32 to vector<1x256xi32>
    %336 = arith.addi %18, %335 : vector<1x256xi32>
    %c16_i32_184 = arith.constant 16 : i32
    %337 = vector.broadcast %c16_i32_184 : i32 to vector<1x256xi32>
    %338 = arith.cmpi slt, %336, %337 : vector<1x256xi32>
    %339 = arith.andi %334, %338 : vector<1x256xi1>
    %cst_185 = arith.constant 0.000000e+00 : f32
    %340 = vector.shape_cast %339 : vector<1x256xi1> to vector<1x256xi1>
    %341 = vector.broadcast %340 : vector<1x256xi1> to vector<4x256xi1>
    %342 = vector.broadcast %cst_185 : f32 to vector<4x256xf32>
    %343 = arith.select %341, %330, %342 : vector<4x256xi1>, vector<4x256xf32>
    %c32_186 = arith.constant 32 : index
    %c768_187 = arith.constant 768 : index
    %344 = vector.load %arg17[%c32_186, %c768_187] : memref<36x1024xf32, #tpu.memory_space<vmem>>, vector<4x256xf32>
    tpu.vector_store %arg17[%c32_186, %c768_187], %343 {strides = array<i32>} : memref<36x1024xf32, #tpu.memory_space<vmem>>, vector<4x256xf32>,
    %c0_188 = arith.constant 0 : index
    %c0_189 = arith.constant 0 : index
    %345 = vector.load %arg8[%c0_188, %c0_189] : memref<4x36xf32, #tpu.memory_space<vmem>>, vector<4x36xf32>
    %c0_190 = arith.constant 0 : index
    %c0_191 = arith.constant 0 : index
    %346 = vector.load %arg17[%c0_190, %c0_191] : memref<36x1024xf32, #tpu.memory_space<vmem>>, vector<36x1024xf32>
    %cst_192 = arith.constant dense<0.000000e+00> : vector<4x1024xf32>
    %347 = tpu.matmul %345, %346, %cst_192 {dimension_numbers = #tpu.dot_dimension_numbers<[1], [0], [0], [1], [0, 0, 1, 1], [], []>} : vector<4x36xf32>, vector<36x1024xf32>, vector<4x1024xf32> -> vector<4x1024xf32>
    %c0_193 = arith.constant 0 : index
    %c0_194 = arith.constant 0 : index
    %348 = vector.load %arg9[%c0_193, %c0_194] : memref<4x1xf32, #tpu.memory_space<vmem>>, vector<4x1xf32>
    %349 = vector.broadcast %348 : vector<4x1xf32> to vector<4x1024xf32>
    %350 = arith.addf %347, %349 : vector<4x1024xf32>
    %cst_195 = arith.constant 0.000000e+00 : f32
    %351 = vector.broadcast %cst_195 : f32 to vector<4x1024xf32>
    %352 = arith.cmpf ogt, %350, %351 : vector<4x1024xf32>
    %c0_196 = arith.constant 0 : index
    %c0_197 = arith.constant 0 : index
    %353 = vector.load %arg10[%c0_196, %c0_197] : memref<4x1xf32, #tpu.memory_space<vmem>>, vector<4x1xf32>
    %354 = vector.broadcast %353 : vector<4x1xf32> to vector<4x1024xf32>
    %355 = arith.mulf %354, %350 : vector<4x1024xf32>
    %356 = arith.select %352, %350, %355 : vector<4x1024xi1>, vector<4x1024xf32>
    %c0_198 = arith.constant 0 : index
    %c0_199 = arith.constant 0 : index
    %357 = vector.load %arg11[%c0_198, %c0_199] : memref<4x4xf32, #tpu.memory_space<vmem>>, vector<4x4xf32>
    %cst_200 = arith.constant dense<0.000000e+00> : vector<4x1024xf32>
    %358 = tpu.matmul %357, %356, %cst_200 {dimension_numbers = #tpu.dot_dimension_numbers<[1], [0], [0], [1], [0, 0, 1, 1], [], []>} : vector<4x4xf32>, vector<4x1024xf32>, vector<4x1024xf32> -> vector<4x1024xf32>
    %c0_201 = arith.constant 0 : index
    %c0_202 = arith.constant 0 : index
    %359 = vector.load %arg12[%c0_201, %c0_202] : memref<4x1xf32, #tpu.memory_space<vmem>>, vector<4x1xf32>
    %360 = vector.broadcast %359 : vector<4x1xf32> to vector<4x1024xf32>
    %361 = arith.addf %358, %360 : vector<4x1024xf32>
    %cst_203 = arith.constant 0.000000e+00 : f32
    %362 = vector.broadcast %cst_203 : f32 to vector<4x1024xf32>
    %363 = arith.cmpf ogt, %361, %362 : vector<4x1024xf32>
    %c0_204 = arith.constant 0 : index
    %c0_205 = arith.constant 0 : index
    %364 = vector.load %arg13[%c0_204, %c0_205] : memref<4x1xf32, #tpu.memory_space<vmem>>, vector<4x1xf32>
    %365 = vector.broadcast %364 : vector<4x1xf32> to vector<4x1024xf32>
    %366 = arith.mulf %365, %361 : vector<4x1024xf32>
    %367 = arith.select %363, %361, %366 : vector<4x1024xi1>, vector<4x1024xf32>
    %c0_206 = arith.constant 0 : index
    %c0_207 = arith.constant 0 : index
    %368 = vector.load %arg14[%c0_206, %c0_207] : memref<4x4xf32, #tpu.memory_space<vmem>>, vector<4x4xf32>
    %cst_208 = arith.constant dense<0.000000e+00> : vector<4x256xf32>
    %369 = tpu.matmul %368, %1, %cst_208 {dimension_numbers = #tpu.dot_dimension_numbers<[1], [0], [0], [1], [0, 0, 1, 1], [], []>} : vector<4x4xf32>, vector<4x256xf32>, vector<4x256xf32> -> vector<4x256xf32>
    %cst_209 = arith.constant dense<0.000000e+00> : vector<4xf32>
    %370 = vector.multi_reduction <add>, %369, %cst_209 [1] : vector<4x256xf32> to vector<4xf32>
    %371 = vector.shape_cast %370 : vector<4xf32> to vector<4x1xf32>
    %cst_210 = arith.constant 2.560000e+02 : f32
    %372 = vector.broadcast %cst_210 : f32 to vector<4x1xf32>
    %373 = arith.divf %371, %372 : vector<4x1xf32>
    %374 = vector.broadcast %373 : vector<4x1xf32> to vector<4x1024xf32>
    %375 = arith.addf %367, %374 : vector<4x1024xf32>
    %c0_211 = arith.constant 0 : index
    %c0_212 = arith.constant 0 : index
    %c0_213 = arith.constant 0 : index
    %376 = vector.load %arg15[%c0_211, %c0_212, %c0_213] : memref<1x4x1024xf32, #tpu.memory_space<vmem>>, vector<1x4x1024xf32>
    %377 = vector.shape_cast %376 : vector<1x4x1024xf32> to vector<4x1024xf32>
    %378 = vector.shape_cast %375 : vector<4x1024xf32> to vector<1x4x1024xf32>
    tpu.vector_store %arg15[%c0_211, %c0_212, %c0_213], %378 {strides = array<i32>} : memref<1x4x1024xf32, #tpu.memory_space<vmem>>, vector<1x4x1024xf32>,
    return
  }
  func.func @transform_0(%arg0: i32) -> (i32, i32, i32) {
    %c0_i32 = arith.constant 0 : i32
    %c0_i32_0 = arith.constant 0 : i32
    %c0_i32_1 = arith.constant 0 : i32
    return %arg0, %c0_i32, %c0_i32_0 : i32, i32, i32
  }
  func.func @transform_1(%arg0: i32) -> (i32, i32) {
    %c0_i32 = arith.constant 0 : i32
    %c0_i32_0 = arith.constant 0 : i32
    %c0_i32_1 = arith.constant 0 : i32
    return %c0_i32, %c0_i32_0 : i32, i32
  }
  func.func @transform_2(%arg0: i32) -> (i32, i32) {
    %c0_i32 = arith.constant 0 : i32
    %c0_i32_0 = arith.constant 0 : i32
    %c0_i32_1 = arith.constant 0 : i32
    return %c0_i32, %c0_i32_0 : i32, i32
  }
  func.func @transform_3(%arg0: i32) -> (i32, i32) {
    %c0_i32 = arith.constant 0 : i32
    %c0_i32_0 = arith.constant 0 : i32
    %c0_i32_1 = arith.constant 0 : i32
    return %c0_i32, %c0_i32_0 : i32, i32
  }
  func.func @transform_4(%arg0: i32) -> (i32, i32) {
    %c0_i32 = arith.constant 0 : i32
    %c0_i32_0 = arith.constant 0 : i32
    %c0_i32_1 = arith.constant 0 : i32
    return %c0_i32, %c0_i32_0 : i32, i32
  }
  func.func @transform_5(%arg0: i32) -> (i32, i32) {
    %c0_i32 = arith.constant 0 : i32
    %c0_i32_0 = arith.constant 0 : i32
    %c0_i32_1 = arith.constant 0 : i32
    return %c0_i32, %c0_i32_0 : i32, i32
  }
  func.func @transform_6(%arg0: i32) -> (i32, i32) {
    %c0_i32 = arith.constant 0 : i32
    %c0_i32_0 = arith.constant 0 : i32
    %c0_i32_1 = arith.constant 0 : i32
    return %c0_i32, %c0_i32_0 : i32, i32
  }
  func.func @transform_7(%arg0: i32) -> (i32, i32) {
    %c0_i32 = arith.constant 0 : i32
    %c0_i32_0 = arith.constant 0 : i32
    %c0_i32_1 = arith.constant 0 : i32
    return %c0_i32, %c0_i32_0 : i32, i32
  }
  func.func @transform_8(%arg0: i32) -> (i32, i32) {
    %c0_i32 = arith.constant 0 : i32
    %c0_i32_0 = arith.constant 0 : i32
    %c0_i32_1 = arith.constant 0 : i32
    return %c0_i32, %c0_i32_0 : i32, i32
  }
  func.func @transform_9(%arg0: i32) -> (i32, i32) {
    %c0_i32 = arith.constant 0 : i32
    %c0_i32_0 = arith.constant 0 : i32
    %c0_i32_1 = arith.constant 0 : i32
    return %c0_i32, %c0_i32_0 : i32, i32
  }
  func.func @transform_10(%arg0: i32) -> (i32, i32) {
    %c0_i32 = arith.constant 0 : i32
    %c0_i32_0 = arith.constant 0 : i32
    %c0_i32_1 = arith.constant 0 : i32
    return %c0_i32, %c0_i32_0 : i32, i32
  }
  func.func @transform_11(%arg0: i32) -> (i32, i32) {
    %c0_i32 = arith.constant 0 : i32
    %c0_i32_0 = arith.constant 0 : i32
    %c0_i32_1 = arith.constant 0 : i32
    return %c0_i32, %c0_i32_0 : i32, i32
  }
  func.func @transform_12(%arg0: i32) -> (i32, i32) {
    %c0_i32 = arith.constant 0 : i32
    %c0_i32_0 = arith.constant 0 : i32
    %c0_i32_1 = arith.constant 0 : i32
    return %c0_i32, %c0_i32_0 : i32, i32
  }
  func.func @transform_13(%arg0: i32) -> (i32, i32) {
    %c0_i32 = arith.constant 0 : i32
    %c0_i32_0 = arith.constant 0 : i32
    %c0_i32_1 = arith.constant 0 : i32
    return %c0_i32, %c0_i32_0 : i32, i32
  }
  func.func @transform_14(%arg0: i32) -> (i32, i32, i32) {
    %c0_i32 = arith.constant 0 : i32
    %c0_i32_0 = arith.constant 0 : i32
    %c0_i32_1 = arith.constant 0 : i32
    return %arg0, %c0_i32, %c0_i32_0 : i32, i32, i32
  }
}

</mosaic_0001>

<bundles_post_ra>
// kernel: rpp_forward_pallas.1
= control target key start
LH: loop header
LB: loop body
LE: loop exit
PB: predicated region body
PF: predicated region fallthrough
CT: control target
= control target key end

     0   :  { %s1956_s29 = smov 0   ;;  %s2243_s0 = inlined_call_operand.vmem [shape: f32[2,4,256], index: 0, kind: input, shape index: {}]   ;;  %s2244_s1 = inlined_call_operand.vmem [shape: f32[16,36], index: 1, kind: input, shape index: {}]   ;;  %s2245_s2 = inlined_call_operand.vmem [shape: f32[16,1], index: 2, kind: input, shape index: {}]   ;;  %s2246_s3 = inlined_call_operand.vmem [shape: f32[16,1], index: 3, kind: input, shape index: {}]   ;;  %s2247_s4 = inlined_call_operand.vmem [shape: f32[16,16], index: 4, kind: input, shape index: {}]   ;;  %s2248_s5 = inlined_call_operand.vmem [shape: f32[16,1], index: 5, kind: input, shape index: {}]   ;;  %s2249_s6 = inlined_call_operand.vmem [shape: f32[16,1], index: 6, kind: input, shape index: {}]   ;;  %s2250_s7 = inlined_call_operand.vmem [shape: f32[4,36], index: 7, kind: input, shape index: {}]   ;;  %s2251_s8 = inlined_call_operand.vmem [shape: f32[4,1], index: 8, kind: input, shape index: {}]   ;;  %s2252_s9 = inlined_call_operand.vmem [shape: f32[4,1], index: 9, kind: input, shape index: {}]   ;;  %s2253_s10 = inlined_call_operand.vmem [shape: f32[4,4], index: 10, kind: input, shape index: {}]   ;;  %s2254_s11 = inlined_call_operand.vmem [shape: f32[4,1], index: 11, kind: input, shape index: {}]   ;;  %s2255_s12 = inlined_call_operand.vmem [shape: f32[4,1], index: 12, kind: input, shape index: {}]   ;;  %s2256_s13 = inlined_call_operand.vmem [shape: f32[4,4], index: 13, kind: input, shape index: {}]   ;;  %s2257_s14 = inlined_call_operand.vmem [shape: f32[2,4,1024], index: 14, kind: output, shape index: {}]  }
   0x1 LB: > { %s1771_s30 = sadd.s32 4294967295, %s1864_s29   ;;  %p1775_p0 = scmp.ge.s32.totalorder %s1864_s29, 1  ;;  %s1864_s29 = sphi %s1956_s29, %s24_s29  }
   0x2   : > { %p412_p1 = scmp.lt.s32.totalorder %s1864_s29, 3 }
   0x4   : > { %p413_p2 = pnand %p1775_p0, %p412_p1 }
   0x5   : > { %p458_p3 = scmp.lt.s32.totalorder (!%p413_p2), %s1771_s30, 1  ;;  %s1866_s19 = smov (!%p413_p2), 64  }
   0x6   : > { %416 = sbr.rel (%p413_p2) target bundleno = 1084 (0x43c), region = 76  ;;  %s1867_s20 = smov (!%p413_p2), 60  }
   0x7   : > { %s1868_s21 = smov (!%p413_p2), 4   ;;  %s1869_s22 = smov (!%p413_p2), 124  }
   0x8   : > { %s1870_s23 = smov (!%p413_p2), 68   ;;  %s1876_s24 = smov (!%p413_p2), 127  }
   0x9   : > { %s1877_s25 = smov (!%p413_p2), 113   ;;  %s1878_s26 = smov (!%p413_p2), 111  }
   0xa   : > { %s1879_s27 = smov (!%p413_p2), 15  }
   0xb   : > { %s2259_s30 = smov (!%p458_p3, %s1771_s30), 1  ;;  %v469_v19 = vlaneseq  ;;  %vm578_vm0 = vcmask 31744   ;;  %vm532_vm2 = vcmask 523264   ;;  %vm550_vm3 = vcmask 490496   ;;  %v682_v63 = vld [vmem:[%s2245_s2 + $0x8] sm:$0xff] }
   0xc   : > { %s1828_s15 = sshll.u32 %s2259_s30, 3  ;;  %vm607_vm6 = vcmask 1014784   ;;  %vm504_vm8 = vcmask 556032   ;;  %vm700_vm9 = vcmask 1043456   ;;  %vm693_vm10 = vcmask 293888   ;;  %s1829_s28 = sshll.u32 %s2259_s30, 5 }
   0xd   : > { %s462_s18 = scalar_lea.vmem %s2243_s0, %s1828_s15  ;;  %v470_v20 = vand.u32 127, %v469_v19  ;;  %v848_v19 = vld [vmem:[%s2249_s6] sm:$0xff]  ;;  %vm791_vm15 = vcmask 130048   ;;  %s467_s17 = scalar_lea.vmem %s2257_s14, %s1829_s28 }
   0xe   : > { %v468_v0 = vld [vmem:[%s462_s18] sm:$0xff] }
   0xf   : > { %497 = vst [vmem:[#allocation1] ss:$2 sm:$0xff] %v468_v0  ;;  %v1978_v22 = vand.u32 15, %v470_v20  ;;  %v471_v28 = vadd.s32 128, %v470_v20  ;;  %v780_v20 = vld [vmem:[%s2248_s5 + $0x8] sm:$0xff] }
  0x11   : > { %v509_v23 = vadd.s32 4294967292, %v1978_v22  ;;  %v1985_v30 = vand.u32 15, %v471_v28  ;;  %v1990_v33 = vadd.s32 4, %v1978_v22  ;;  %v849_v28 = vld [vmem:[%s2249_s6 + $0x8] sm:$0xff] }
  0x13   : > { %vm511_vm1 = vcmp.ge.s32.totalorder %v509_v23, 0  ;;  %v1993_v34 = vadd.s32 4, %v1985_v30  ;;  %vm559_vm4 = vcmp.lt.s32.totalorder %v1990_v33, 16  ;;  %v2004_v41 = vadd.s32 4294967292, %v1985_v30 }
  0x15   : > { %vm560_vm5 = vcmp.lt.s32.totalorder %v1993_v34, 16  ;;  %vm512_vm7 = vcmp.ge.s32.totalorder %v2004_v41, 0  ;;  %v669_v34 = vld [vmem:[%s2244_s1] sm:$0xff] }
  0x16   : > { %v498_v1 = vld.sshfl [vmem:[#allocation1] sm:$0xff pattern:$0x75316420]  ;;  %v499_v2 = vld.sshfl [vmem:[#allocation1 + $0x8] sm:$0xff pattern:$0x75316420] }
  0x17   : > { %525 = vst [vmem:[#allocation1] ss:$2 sm:$0xff] %v468_v0 }
  0x1e   : > { %v526_v3 = vld.sshfl [vmem:[#allocation1] sm:$0xff pattern:$0x75316420]  ;;  %v527_v4 = vld.sshfl [vmem:[#allocation1 + $0x8] sm:$0xff pattern:$0x75316420] }
  0x1f   : > { %543 = vst [vmem:[#allocation1] ss:$2 sm:$0xff] %v468_v0  ;;  %528 = vrot.lane.b32.xlu0 %v526_v3, %s1866_s19 }
  0x26   : > { %v545_v5 = vld.sshfl [vmem:[#allocation1 + $0x8] sm:$0xff pattern:$0x75316420]  ;;  %v544_v6 = vld.sshfl [vmem:[#allocation1] sm:$0xff pattern:$0x75316420] }
  0x27   : > { %548 = vrot.lane.b32.xlu2 %v545_v5, %s1867_s20  ;;  %546 = vrot.lane.b32.xlu1 %v544_v6, %s1867_s20  ;;  %571 = vst [vmem:[#allocation1] ss:$2 sm:$0xff] %v468_v0 }
  0x2e   : > { %v572_v7 = vld.sshfl [vmem:[#allocation1] sm:$0xff pattern:$0x75316420]  ;;  %v573_v8 = vld.sshfl [vmem:[#allocation1 + $0x8] sm:$0xff pattern:$0x75316420] }
  0x2f   : > { %574 = vrot.lane.b32.xlu2 %v572_v7, %s1868_s21  ;;  %576 = vrot.lane.b32.xlu0 %v573_v8, %s1868_s21  ;;  %593 = vst [vmem:[#allocation1] ss:$2 sm:$0xff] %v468_v0  ;;  %v757_v7 = vld [vmem:[%s2246_s3] sm:$0xff]  ;;  %v758_v8 = vld [vmem:[%s2246_s3 + $0x8] sm:$0xff]  ;;  %s1873_s21 = smov 16  }
  0x36   : > { %v594_v9 = vld.sshfl [vmem:[#allocation1] sm:$0xff pattern:$0x75316420]  ;;  %v595_v10 = vld.sshfl [vmem:[#allocation1 + $0x8] sm:$0xff pattern:$0x75316420] }
  0x37   : > { %600 = vst [vmem:[#allocation1] ss:$2 sm:$0xff] %v468_v0 }
  0x38   : > { %598 = vst [vmem:[#allocation2 + $0x48] sm:$0xf] %v594_v9  ;;  %v681_v9 = vld [vmem:[%s2245_s2] sm:$0xff] }
  0x39   : > { %599 = vst [vmem:[#allocation2 + $0x28] sm:$0xf] %v595_v10 }
  0x3e   : > { %v601_v11 = vld.sshfl [vmem:[#allocation1] sm:$0xff pattern:$0x75316420]  ;;  %v602_v12 = vld.sshfl [vmem:[#allocation1 + $0x8] sm:$0xff pattern:$0x75316420] }
  0x3f   : > { %622 = vst [vmem:[#allocation1] ss:$2 sm:$0xff] %v468_v0  ;;  %603 = vrot.lane.b32.xlu2 %v601_v11, %s1869_s22 }
  0x46   : > { %v624_v13 = vld.sshfl [vmem:[#allocation1 + $0x8] sm:$0xff pattern:$0x75316420]  ;;  %v623_v14 = vld.sshfl [vmem:[#allocation1] sm:$0xff pattern:$0x75316420] }
  0x47   : > { %627 = vrot.lane.b32.xlu1 %v624_v13, %s1870_s23  ;;  %625 = vrot.lane.b32.xlu0 %v623_v14, %s1870_s23  ;;  %637 = vst [vmem:[#allocation1] ss:$2 sm:$0xff] %v468_v0 }
  0x48   : > { %605 = vrot.lane.b32.xlu2 %v602_v12, %s1869_s22  ;;  %s1874_s22 = smov 1  }
  0x4e   : > { %v638_v15 = vld.sshfl [vmem:[#allocation1] sm:$0xff pattern:$0x75316420]  ;;  %v639_v16 = vld.sshfl [vmem:[#allocation1 + $0x8] sm:$0xff pattern:$0x75316420] }
  0x4f   : > { %640 = vrot.lane.b32.xlu1 %v638_v15, %s1866_s19  ;;  %654 = vst [vmem:[#allocation1] ss:$2 sm:$0xff] %v468_v0 }
  0x50   : > { %500 = vrot.lane.b32.xlu2 %v498_v1, %s1870_s23 }
  0x56   : > { %v655_v17 = vld.sshfl [vmem:[#allocation1] sm:$0xff pattern:$0x75316420]  ;;  %v656_v18 = vld.sshfl [vmem:[#allocation1 + $0x8] sm:$0xff pattern:$0x75316420] }
  0x57   : > { %642 = vrot.lane.b32.xlu1 %v639_v16, %s1866_s19  ;;  %657 = vrot.lane.b32.xlu0 %v655_v17, %s1867_s20  ;;  %1621 = vst [vmem:[#allocation1] ss:$2 sm:$0xff] %v468_v0  ;;  %v1871_v0 = vmov 0  }
  0x58   : > { %1853 = vset.pattern.permute.xlu1 %v1871_v0  ;;  %1855 = vset.pattern.permute.xlu0 %v1871_v0 }
  0x59   : > { %1854 = vset.pattern.permute.xlu2 %v1871_v0 }
  0x5a   : > { %685 = vperm.xlu2 %1854, %v681_v9  }
  0x5f   : > { %530 = vrot.lane.b32.xlu1 %v527_v4, %s1866_s19  ;;  %659 = vrot.lane.b32.xlu0 %v656_v18, %s1867_s20  ;;  %v779_v18 = vld [vmem:[%s2248_s5] sm:$0xff]  ;;  %s1872_s20 = smov 112  }
  0x62   : > { %788 = vperm.xlu2 %1854, %v780_v20  }
  0x67   : > { %502 = vrot.lane.b32.xlu0 %v499_v2, %s1870_s23  ;;  %690 = vperm.xlu1 %1853, %v682_v63   ;;  %s1875_s23 = smov 17  }
  0x6a   : > { %857 = vperm.xlu2 %1854, %v849_v28  }
  0x6f   : > { %761 = vperm.xlu1 %1853, %v757_v7   ;;  %766 = vperm.xlu0 %1855, %v758_v8  }
  0x77   : > { %783 = vperm.xlu1 %1853, %v779_v18   ;;  %852 = vperm.xlu0 %1855, %v848_v19  }
  0x81   : > { %v549_v21 = vpop.permute.xlu2 %548 }
  0x89   : > { %v575_v24 = vpop.permute.xlu2 %574 }
  0x8a   : > { %v582_v25 = vsel %vm578_vm0, 0.0, %v575_v24 }
  0x8b   : > { %v583_v26 = vsel %vm511_vm1, %v582_v25, 0.0 }
  0x8c   : > { %v587_v27 = vrot.slane %v583_v26, 4 }
  0x8e   : > { %591 = vst [vmem:[#allocation2 + $0x18] sm:$0xf0] %v587_v27 }
  0x91   : > { %v1983_v29 = vpop.permute.xlu0 %528 }
  0x92   : > { %v535_v31 = vsel %vm532_vm2, 0.0, %v1983_v29 }
  0x93   : > { %v537_v32 = vrot.slane %v535_v31, 4 }
  0x95   : > { %541 = vst [vmem:[#allocation2 + $0x30] sm:$0xf0] %v537_v32 }
  0x99   : > { %v604_v35 = vpop.permute.xlu2 %603  ;;  %v547_v36 = vpop.permute.xlu1 %546 }
  0x9a   : > { %v551_v37 = vsel %vm550_vm3, %v547_v36, %v549_v21  ;;  %v554_v38 = vsel %vm550_vm3, 0.0, %v547_v36 }
  0x9b   : > { %v567_v39 = vsel %vm559_vm4, %v554_v38, 0.0  ;;  %v568_v40 = vsel %vm560_vm5, %v551_v37, 0.0  ;;  %v670_v38 = vld [vmem:[%s2244_s1 + $0x8] sm:$0xff] }
  0x9c   : > { %569 = vst [vmem:[#allocation2 + $0x18] sm:$0xf] %v567_v39 }
  0x9d   : > { %570 = vst [vmem:[#allocation2 + $0x10] sm:$0xf] %v568_v40 }
  0xa1   : > { %v577_v42 = vpop.permute.xlu0 %576 }
  0xa2   : > { %v606_v43 = vpop.permute.xlu2 %605  ;;  %v579_v44 = vsel %vm578_vm0, %v575_v24, %v577_v42 }
  0xa3   : > { %v608_v45 = vsel %vm607_vm6, %v604_v35, %v606_v43  ;;  %v611_v46 = vsel %vm607_vm6, %v606_v43, 0.0  ;;  %v584_v47 = vsel %vm512_vm7, %v579_v44, 0.0  ;;  %v673_v33 = vld [vmem:[#allocation2 + $0x18] sm:$0xff]  ;;  %vm876_vm6 = vcmask 138240  }
  0xa4   : > { %v612_v48 = vsel %vm559_vm4, %v608_v45, 0.0  ;;  %v613_v49 = vsel %vm560_vm5, %v611_v46, 0.0  ;;  %v588_v50 = vrot.slane %v584_v47, 4 }
  0xa5   : > { %v616_v51 = vrot.slane %v612_v48, 4  ;;  %v617_v52 = vrot.slane %v613_v49, 4 }
  0xa6   : > { %592 = vst [vmem:[#allocation2 + $0x10] sm:$0xf0] %v588_v50 }
  0xa7   : > { %620 = vst [vmem:[#allocation2 + $0x48] sm:$0xf0] %v616_v51 }
  0xa8   : > { %621 = vst [vmem:[#allocation2 + $0x28] sm:$0xf0] %v617_v52 }
  0xaa   : > { %v501_v53 = vpop.permute.xlu2 %500 }
  0xab   : > { %v508_v54 = vsel %vm504_vm8, 0.0, %v501_v53 }
  0xac   : > { %v521_v55 = vsel %vm511_vm1, %v508_v54, 0.0 }
  0xad   : > { %523 = vst [vmem:[#allocation2 + $0x30] sm:$0xf] %v521_v55  ;;  %v674_v35 = vld [vmem:[#allocation2 + $0x10] sm:$0xff] }
  0xae   : > { %v675_v31 = vld [vmem:[#allocation2 + $0x48] sm:$0xff] }
  0xaf   : > { %v676_v32 = vld [vmem:[#allocation2 + $0x28] sm:$0xff] }
  0xb4   : > { %v671_v36 = vld [vmem:[#allocation2 + $0x30] sm:$0xff]  ;;  %v686_v42 = vpop.permute.xlu2 %685 }
  0xb9   : > { %v628_v56 = vpop.permute.xlu1 %627  ;;  %v626_v57 = vpop.permute.xlu0 %625 }
  0xba   : > { %v632_v58 = vsel %vm504_vm8, %v628_v56, 0.0  ;;  %v629_v59 = vsel %vm504_vm8, %v626_v57, %v628_v56  ;;  %v777_v56 = vld [vmem:[%s2247_s4] sm:$0xff] }
  0xbb   : > { %v634_v60 = vsel %vm512_vm7, %v632_v58, 0.0  ;;  %v633_v61 = vsel %vm511_vm1, %v629_v59, 0.0 }
  0xbc   : > { %636 = vst [vmem:[#allocation2 + $0x20] sm:$0xf] %v634_v60  ;;  %v778_v60 = vld [vmem:[%s2247_s4 + $0x8] sm:$0xff] }
  0xbd   : > { %635 = vst [vmem:[#allocation2 + $0x8] sm:$0xf] %v633_v61  ;;  %v789_v61 = vpop.permute.xlu2 %788 }
  0xc1   : > { %v641_v62 = vpop.permute.xlu1 %640 }
  0xc9   : > { %v643_v1 = vpop.permute.xlu1 %642  ;;  %v658_v2 = vpop.permute.xlu0 %657 }
  0xca   : > { %v644_v3 = vsel %vm532_vm2, %v641_v62, %v643_v1  ;;  %v646_v4 = vsel %vm532_vm2, %v643_v1, 0.0 }
  0xcb   : > { %v648_v5 = vrot.slane %v644_v3, 4  ;;  %v649_v6 = vrot.slane %v646_v4, 4 }
  0xcd   : > { %652 = vst [vmem:[#allocation2 + $0x8] sm:$0xf0] %v648_v5 }
  0xce   : > { %653 = vst [vmem:[#allocation2 + $0x20] sm:$0xf0] %v649_v6 }
  0xd1   : > { %v531_v10 = vpop.permute.xlu1 %530  ;;  %v660_v11 = vpop.permute.xlu0 %659 }
  0xd2   : > { %v533_v12 = vsel %vm532_vm2, %v1983_v29, %v531_v10  ;;  %v661_v13 = vsel %vm550_vm3, %v658_v2, %v660_v11  ;;  %v664_v14 = vsel %vm550_vm3, %v660_v11, 0.0  ;;  %v858_v11 = vpop.permute.xlu2 %857 }
  0xd3   : > { %v538_v15 = vrot.slane %v533_v12, 4  ;;  %v665_v16 = vsel %vm559_vm4, %v661_v13, 0.0  ;;  %v666_v17 = vsel %vm560_vm5, %v664_v14, 0.0  ;;  %vm1083_vm5 = vcmask 916480  }
  0xd4   : > { %667 = vst [vmem:[#allocation2 + $0x40] sm:$0xf] %v665_v16  ;;  %v677_v27 = vld [vmem:[#allocation2 + $0x8] sm:$0xff] }
  0xd5   : > { %542 = vst [vmem:[#allocation2] sm:$0xf0] %v538_v15  ;;  %v678_v29 = vld [vmem:[#allocation2 + $0x20] sm:$0xff] }
  0xd6   : > { %668 = vst [vmem:[#allocation2 + $0x38] sm:$0xf] %v666_v17 }
  0xd9   : > { %v503_v21 = vpop.permute.xlu0 %502  ;;  %v691_v39 = vpop.permute.xlu1 %690 }
  0xda   : > { %v505_v23 = vsel %vm504_vm8, %v501_v53, %v503_v21 }
  0xdb   : > { %v522_v24 = vsel %vm512_vm7, %v505_v23, 0.0  ;;  %v679_v25 = vld [vmem:[#allocation2 + $0x40] sm:$0xf]  ;;  %vm930_vm7 = vcmask 7168  }
  0xdc   : > { %524 = vst [vmem:[#allocation2] sm:$0xf] %v522_v24  ;;  %1780 = vmatpush.msk.msra.mxu0 %vm700_vm9, %v679_v25  ;;  %v1374_v24 = vld [vmem:[%s2252_s9] sm:$0xf] }
  0xdd   : > { %v680_v26 = vld [vmem:[#allocation2 + $0x38] sm:$0xf] }
  0xde   : > { %1783 = vmatpush.msk.msra.mxu1 %vm700_vm9, %v680_v26  ;;  %719 = vmatpush.msra.mxu0 %v677_v27  ;;  %v1173_v25 = vld [vmem:[%s2251_s8] sm:$0xf] }
  0xdf   : > { %v1397_v26 = vld [vmem:[%s2254_s11] sm:$0xf] }
  0xe0   : > { %742 = vmatpush.msra.mxu1 %v678_v29  ;;  %720 = vmatpush.msra.mxu0 %v675_v31  ;;  %v1598_v27 = vld [vmem:[%s2255_s12] sm:$0xf] }
  0xe1   : > { %v762_v45 = vpop.permute.xlu1 %761  ;;  %v767_v48 = vpop.permute.xlu0 %766 }
  0xe2   : > { %743 = vmatpush.msra.mxu1 %v676_v32  ;;  %721 = vmatpush.msra.mxu0 %v673_v33 }
  0xe3   : > { %v672_v37 = vld [vmem:[#allocation2] sm:$0xff] }
  0xe4   : > { %744 = vmatpush.msra.mxu1 %v674_v35  ;;  %722 = vmatpush.msra.mxu0 %v671_v36 }
  0xe5   : > { %1781 = vmatmul.msk.f32.vlgmr.msra.gmra.mxu0 %vm693_vm10, %v669_v34 }
  0xe6   : > { %745 = vmatpush.msra.mxu1 %v672_v37 }
  0xe7   : > { %1784 = vmatmul.msk.f32.vlgmr.msra.gmra.mxu1 %vm693_vm10, %v669_v34 }
  0xe9   : > { %v784_v62 = vpop.permute.xlu1 %783  ;;  %v853_v1 = vpop.permute.xlu0 %852 }
  0xed   : > { %1782 = vmatmul.msk.f32.gmra.mxu0 %vm693_vm10, %v670_v38 }
  0xef   : > { %1785 = vmatmul.msk.f32.gmra.mxu1 %vm693_vm10, %v670_v38  ;;  %v2118_v38 = vadd.s32 4294967295, %v1978_v22 }
  0xf1   : > { %vm883_vm8 = vcmp.ge.s32.totalorder %v2118_v38, 0 }
 0x162   : > { %v724_v40 = vpop.f32.mrf.mxu0 }
 0x163   : > { %v725_v43 = vadd.f32 %v724_v40, %v686_v42 }
 0x164   : > { %v747_v41 = vpop.f32.mrf.mxu1 }
 0x165   : > { %v748_v46 = vadd.f32 %v747_v41, %v686_v42  ;;  %v769_v52 = vmul.f32 %v762_v45, %v725_v43  ;;  %vm753_vm12 = vcmp.gt.f32.partialorder %v725_v43, 0.0  ;;  %v882_v41 = vadd.s32 4294967295, %v1985_v30 }
 0x167   : > { %v770_v55 = vmul.f32 %v762_v45, %v748_v46  ;;  %vm754_vm14 = vcmp.gt.f32.partialorder %v748_v46, 0.0  ;;  %v773_v58 = vsel %vm753_vm12, %v725_v43, %v769_v52  ;;  %vm1064_vm12 = vcmask 924672  }
 0x169   : > { %v774_v59 = vsel %vm754_vm14, %v748_v46, %v770_v55 }
 0x16a   : > { %v727_v44 = vpop.f32.mrf.mxu0 }
 0x16b   : > { %v728_v47 = vadd.f32 %v727_v44, %v691_v39 }
 0x16c   : > { %v750_v49 = vpop.f32.mrf.mxu1 }
 0x16d   : > { %v751_v50 = vadd.f32 %v750_v49, %v691_v39  ;;  %vm755_vm11 = vcmp.gt.f32.partialorder %v728_v47, 0.0  ;;  %v771_v51 = vmul.f32 %v767_v48, %v728_v47 }
 0x16f   : > { %v775_v53 = vsel %vm755_vm11, %v728_v47, %v771_v51  ;;  %vm756_vm13 = vcmp.gt.f32.partialorder %v751_v50, 0.0  ;;  %v772_v54 = vmul.f32 %v767_v48, %v751_v50  ;;  %vm884_vm11 = vcmp.ge.s32.totalorder %v882_v41, 0 }
 0x170   : > { %812 = vmatpush.msra.mxu2 %v775_v53 }
 0x171   : > { %v776_v57 = vsel %vm756_vm13, %v751_v50, %v772_v54  ;;  %vm1011_vm13 = vcmask 1039360  }
 0x172   : > { %835 = vmatpush.msra.mxu3 %v776_v57  ;;  %813 = vmatpush.msra.mxu2 %v773_v58 }
 0x173   : > { %1786 = vmatmul.msk.f32.vlgmr.msra.gmra.mxu2 %vm791_vm15, %v777_v56 }
 0x174   : > { %836 = vmatpush.msra.mxu3 %v774_v59 }
 0x175   : > { %1788 = vmatmul.msk.f32.vlgmr.msra.gmra.mxu3 %vm791_vm15, %v777_v56 }
 0x17b   : > { %1787 = vmatmul.msk.f32.gmra.mxu2 %vm791_vm15, %v778_v60 }
 0x17d   : > { %1789 = vmatmul.msk.f32.gmra.mxu3 %vm791_vm15, %v778_v60 }
 0x1f6   : > { %v815_v63 = vpop.f32.mrf.mxu2 }
 0x1f7   : > { %v816_v0 = vadd.f32 %v815_v63, %v784_v62 }
 0x1f8   : > { %v838_v2 = vpop.f32.mrf.mxu3 }
 0x1f9   : > { %vm844_vm1 = vcmp.gt.f32.partialorder %v816_v0, 0.0  ;;  %v860_v3 = vmul.f32 %v853_v1, %v816_v0  ;;  %v839_v4 = vadd.f32 %v838_v2, %v784_v62 }
 0x1fb   : > { %v2080_v5 = vsel %vm844_vm1, %v816_v0, %v860_v3  ;;  %vm845_vm2 = vcmp.gt.f32.partialorder %v839_v4, 0.0  ;;  %v861_v6 = vmul.f32 %v853_v1, %v839_v4  ;;  %vm1123_vm1 = vcmask 908288  }
 0x1fc   : > { %945 = vst [vmem:[#allocation3 + $0x78] sm:$0xff] %v2080_v5   ;;  %1079 = vrot.lane.b32.xlu0 %v2080_v5, %s1872_s20  ;;  %v924_v15 = vrot.slane %v2080_v5, 4 }
 0x1fd   : > { %1097 = vst [vmem:[#allocation3 + $0x18] sm:$0xff] %v2080_v5   ;;  %v2085_v7 = vsel %vm845_vm2, %v839_v4, %v861_v6  ;;  %vm980_vm2 = vcmask 121856  }
 0x1fe   : > { %946 = vst [vmem:[#allocation3 + $0xa0] sm:$0xff] %v2085_v7   ;;  %1081 = vrot.lane.b32.xlu1 %v2085_v7, %s1872_s20  ;;  %v818_v8 = vpop.f32.mrf.mxu2  ;;  %v925_v9 = vrot.slane %v2085_v7, 4 }
 0x1ff   : > { %1098 = vst [vmem:[#allocation3 + $0x110] sm:$0xff] %v2085_v7   ;;  %v819_v10 = vadd.f32 %v818_v8, %v789_v61 }
 0x200   : > { %v841_v12 = vpop.f32.mrf.mxu3  ;;  %1004 = vst [vmem:[#allocation3 + $0x58] sm:$0xf0] %v925_v9 }
 0x201   : > { %vm846_vm3 = vcmp.gt.f32.partialorder %v819_v10, 0.0  ;;  %v862_v13 = vmul.f32 %v858_v11, %v819_v10  ;;  %v842_v14 = vadd.f32 %v841_v12, %v789_v61  ;;  %1006 = vst [vmem:[#allocation3 + $0xf8] sm:$0xf] %v925_v9 }
 0x202   : > { %1045 = vst [vmem:[#allocation3 + $0x130] sm:$0xf0] %v925_v9 }
 0x203   : > { %v866_v16 = vsel %vm846_vm3, %v819_v10, %v862_v13  ;;  %vm847_vm4 = vcmp.gt.f32.partialorder %v842_v14, 0.0  ;;  %v863_v17 = vmul.f32 %v858_v11, %v842_v14  ;;  %1047 = vst [vmem:[#allocation3 + $0x70] sm:$0xf] %v925_v9  ;;  %v2146_v10 = vadd.s32 1, %v1985_v30 }
 0x204   : > { %v870_v18 = vrot.slane %v866_v16, 4  ;;  %1026 = vst [vmem:[#allocation3 + $0x28] sm:$0xff] %v866_v16   ;;  %897 = vrot.lane.b32.xlu2 %v866_v16, %s1873_s21  ;;  %926 = vrot.lane.b32.xlu0 %v924_v15, %s1874_s22 }
 0x205   : > { %1056 = vst [vmem:[#allocation3 + $0x80] sm:$0xff] %v866_v16   ;;  %v867_v19 = vsel %vm847_vm4, %v842_v14, %v863_v17  ;;  %v1150_v30 = vld [vmem:[#allocation3 + $0xa0] sm:$0xff] }
 0x206   : > { %963 = vst [vmem:[#allocation3 + $0x48] sm:$0xf0] %v870_v18  ;;  %928 = vrot.lane.b32.xlu1 %v925_v9, %s1874_s22  ;;  %v871_v20 = vrot.slane %v867_v19, 4  ;;  %v2143_v9 = vadd.s32 1, %v1978_v22 }
 0x207   : > { %965 = vst [vmem:[#allocation3 + $0x100] sm:$0xf] %v870_v18 }
 0x208   : > { %1103 = vst [vmem:[#allocation3 + $0x90] sm:$0xf0] %v870_v18  ;;  %vm989_vm14 = vcmp.lt.s32.totalorder %v2143_v9, 16 }
 0x209   : > { %1105 = vst [vmem:[#allocation3 + $0x40] sm:$0xf] %v870_v18 }
 0x20a   : > { %1027 = vst [vmem:[#allocation3 + $0x68] sm:$0xff] %v867_v19  }
 0x20b   : > { %1057 = vst [vmem:[#allocation3 + $0xd8] sm:$0xff] %v867_v19  }
 0x20c   : > { %964 = vst [vmem:[#allocation3 + $0x118] sm:$0xf0] %v871_v20  ;;  %951 = vrot.lane.b32.xlu2 %v871_v20, %s1874_s22  ;;  %899 = vrot.lane.b32.xlu0 %v867_v19, %s1873_s21 }
 0x20d   : > { %966 = vst [vmem:[#allocation3 + $0x30] sm:$0xf] %v871_v20 }
 0x20e   : > { %1104 = vst [vmem:[#allocation3 + $0xc8] sm:$0xf0] %v871_v20  ;;  %949 = vrot.lane.b32.xlu1 %v870_v18, %s1874_s22  ;;  %v1165_v21 = vld [vmem:[#allocation3 + $0x100] sm:$0xf] }
 0x20f   : > { %1106 = vst [vmem:[#allocation3 + $0x88] sm:$0xf] %v871_v20  ;;  %1790 = vmatpush.msk.msrb.mxu2 %vm700_vm9, %v1165_v21 }
 0x210   : > { %1003 = vst [vmem:[#allocation3 + $0x20] sm:$0xf0] %v924_v15 }
 0x211   : > { %1005 = vst [vmem:[#allocation3 + $0x98] sm:$0xf] %v924_v15 }
 0x212   : > { %1044 = vst [vmem:[#allocation3 + $0x50] sm:$0xf0] %v924_v15 }
 0x213   : > { %1046 = vst [vmem:[#allocation3 + $0x60] sm:$0xf] %v924_v15  ;;  %v1149_v15 = vld [vmem:[#allocation3 + $0x78] sm:$0xff] }
 0x214   : > { %v1166_v23 = vld [vmem:[#allocation3 + $0x30] sm:$0xf]  ;;  %914 = vrot.lane.b32.xlu2 %v871_v20, %s1873_s21  ;;  %874 = vrot.lane.b32.xlu0 %v871_v20, %s1875_s23 }
 0x215   : > { %1792 = vmatpush.msk.msrb.mxu3 %vm700_vm9, %v1166_v23  ;;  %v2159_v23 = vld [vmem:[%s2250_s7] sm:$0xf] }
 0x216   : > { %912 = vrot.lane.b32.xlu1 %v870_v18, %s1873_s21 }
 0x21c   : > { %872 = vrot.lane.b32.xlu2 %v870_v18, %s1875_s23  ;;  %1032 = vrot.lane.b32.xlu0 %v867_v19, %s1876_s24 }
 0x21e   : > { %1060 = vrot.lane.b32.xlu1 %v2080_v5, %s1877_s25 }
 0x224   : > { %1062 = vrot.lane.b32.xlu2 %v2085_v7, %s1877_s25  ;;  %1007 = vrot.lane.b32.xlu0 %v2080_v5, %s1876_s24 }
 0x226   : > { %1009 = vrot.lane.b32.xlu1 %v2085_v7, %s1876_s24 }
 0x22c   : > { %1030 = vrot.lane.b32.xlu2 %v866_v16, %s1876_s24  ;;  %1121 = vrot.lane.b32.xlu0 %v2085_v7, %s1878_s26 }
 0x22e   : > { %976 = vrot.lane.b32.xlu1 %v866_v16, %s1879_s27 }
 0x234   : > { %978 = vrot.lane.b32.xlu2 %v867_v19, %s1879_s27  ;;  %1377 = vperm.xlu0 %1855, %v1374_v24  }
 0x236   : > { %1119 = vrot.lane.b32.xlu1 %v2080_v5, %s1878_s26 }
 0x23c   : > { %1176 = vperm.xlu2 %1854, %v1173_v25  }
 0x23e   : > { %1400 = vperm.xlu1 %1853, %v1397_v26  }
 0x244   : > { %1601 = vperm.xlu2 %1854, %v1598_v27  }
 0x25e   : > { %v898_v28 = vpop.permute.xlu2 %897 }
 0x25f   : > { %v904_v29 = vsel %vm791_vm15, 0.0, %v898_v28 }
 0x260   : > { %v906_v31 = vrot.slane %v904_v29, 4  ;;  %967 = vst [vmem:[#allocation3 + $0x38] sm:$0xf] %v904_v29 }
 0x262   : > { %910 = vst [vmem:[#allocation3 + $0xa8] sm:$0xf0] %v906_v31 }
 0x266   : > { %v952_v32 = vpop.permute.xlu2 %951 }
 0x26e   : > { %v915_v33 = vpop.permute.xlu2 %914  ;;  %v1080_v34 = vpop.permute.xlu0 %1079 }
 0x270   : > { %v1082_v35 = vpop.permute.xlu1 %1081 }
 0x271   : > { %v1087_v36 = vsel %vm1083_vm5, %v1082_v35, 0.0  ;;  %v1084_v37 = vsel %vm1083_vm5, %v1080_v34, %v1082_v35 }
 0x272   : > { %v1090_v39 = vrot.slane %v1087_v36, 4  ;;  %1116 = vst [vmem:[#allocation3] sm:$0xff] %v1087_v36   ;;  %v1089_v40 = vrot.slane %v1084_v37, 4 }
 0x273   : > { %1115 = vst [vmem:[#allocation3 + $0xc0] sm:$0xff] %v1084_v37  }
 0x274   : > { %1094 = vst [vmem:[#allocation3 + $0x138] sm:$0xf0] %v1090_v39 }
 0x275   : > { %1096 = vst [vmem:[#allocation3 + $0x8] sm:$0xf] %v1090_v39 }
 0x276   : > { %1093 = vst [vmem:[#allocation3 + $0x128] sm:$0xf0] %v1089_v40  ;;  %v873_v42 = vpop.permute.xlu2 %872  ;;  %v927_v43 = vpop.permute.xlu0 %926 }
 0x277   : > { %1095 = vst [vmem:[#allocation3 + $0xd0] sm:$0xf] %v1089_v40  ;;  %v880_v44 = vsel %vm876_vm6, 0.0, %v873_v42  ;;  %v934_v45 = vsel %vm930_vm7, 0.0, %v927_v43 }
 0x278   : > { %v929_v46 = vpop.permute.xlu1 %928  ;;  %v893_v47 = vsel %vm883_vm8, %v880_v44, 0.0  ;;  %v935_v48 = vsel %vm883_vm8, %v934_v45, 0.0  ;;  %v1154_v45 = vld [vmem:[#allocation3 + $0xd8] sm:$0xff] }
 0x279   : > { %895 = vst [vmem:[#allocation3 + $0xa8] sm:$0xf] %v893_v47  ;;  %v931_v49 = vsel %vm930_vm7, %v927_v43, %v929_v46  ;;  %v939_v50 = vrot.slane %v935_v48, 4  ;;  %v1159_v46 = vld [vmem:[#allocation3 + $0x28] sm:$0xff]  ;;  %v1164_v9 = vld [vmem:[#allocation3] sm:$0xff] }
 0x27a   : > { %v936_v51 = vsel %vm884_vm11, %v931_v49, 0.0  ;;  %1042 = vst [vmem:[#allocation3 + $0x50] sm:$0xf] %v935_v48  ;;  %v1160_v49 = vld [vmem:[#allocation3 + $0x68] sm:$0xff] }
 0x27b   : > { %v940_v52 = vrot.slane %v936_v51, 4  ;;  %943 = vst [vmem:[#allocation3 + $0x10] sm:$0xf0] %v939_v50 }
 0x27c   : > { %1043 = vst [vmem:[#allocation3 + $0x130] sm:$0xf] %v936_v51  ;;  %v1170_v35 = vld [vmem:[#allocation3 + $0x8] sm:$0xf] }
 0x27d   : > { %944 = vst [vmem:[#allocation3 + $0xe8] sm:$0xf0] %v940_v52 }
 0x27e   : > { %v1063_v53 = vpop.permute.xlu2 %1062  ;;  %v900_v54 = vpop.permute.xlu0 %899  ;;  %v1169_v34 = vld [vmem:[#allocation3 + $0xd0] sm:$0xf] }
 0x27f   : > { %v1068_v55 = vsel %vm1064_vm12, %v1063_v53, 0.0  ;;  %v901_v56 = vsel %vm791_vm15, %v898_v28, %v900_v54 }
 0x280   : > { %v1070_v57 = vsel %vm884_vm11, %v1068_v55, 0.0  ;;  %v950_v58 = vpop.permute.xlu1 %949  ;;  %v907_v59 = vrot.slane %v901_v56, 4  ;;  %968 = vst [vmem:[#allocation3 + $0x120] sm:$0xf] %v901_v56 }
 0x281   : > { %v1074_v60 = vrot.slane %v1070_v57, 4  ;;  %v953_v61 = vsel %vm930_vm7, %v950_v58, %v952_v32  ;;  %v956_v62 = vsel %vm930_vm7, 0.0, %v950_v58 }
 0x282   : > { %v957_v63 = vsel %vm883_vm8, %v956_v62, 0.0  ;;  %v958_v0 = vsel %vm884_vm11, %v953_v61, 0.0  ;;  %911 = vst [vmem:[#allocation3 + $0xe0] sm:$0xf0] %v907_v59 }
 0x283   : > { %1078 = vst [vmem:[#allocation3 + $0x138] sm:$0xf] %v1074_v60  ;;  %v1050_v1 = vrot.slane %v957_v63, 4  ;;  %v1051_v2 = vrot.slane %v958_v0, 4  ;;  %v1138_v52 = vld [vmem:[#allocation3 + $0x130] sm:$0xff] }
 0x284   : > { %959 = vst [vmem:[#allocation3 + $0x48] sm:$0xf] %v957_v63 }
 0x285   : > { %960 = vst [vmem:[#allocation3 + $0x118] sm:$0xf] %v958_v0  ;;  %v1137_v0 = vld [vmem:[#allocation3 + $0x50] sm:$0xff] }
 0x286   : > { %1054 = vst [vmem:[#allocation3 + $0x60] sm:$0xf0] %v1050_v1  ;;  %v875_v3 = vpop.permute.xlu0 %874  ;;  %v1031_v22 = vpop.permute.xlu2 %1030 }
 0x287   : > { %1055 = vst [vmem:[#allocation3 + $0x70] sm:$0xf0] %v1051_v2  ;;  %v877_v4 = vsel %vm876_vm6, %v873_v42, %v875_v3 }
 0x288   : > { %v913_v5 = vpop.permute.xlu1 %912  ;;  %v894_v6 = vsel %vm884_vm11, %v877_v4, 0.0 }
 0x289   : > { %v916_v7 = vsel %vm791_vm15, %v913_v5, %v915_v33  ;;  %v919_v8 = vsel %vm791_vm15, 0.0, %v913_v5  ;;  %896 = vst [vmem:[#allocation3 + $0xe0] sm:$0xf] %v894_v6  ;;  %vm990_vm15 = vcmp.lt.s32.totalorder %v2146_v10, 16  ;;  %v1133_v33 = vld [vmem:[#allocation3 + $0xa8] sm:$0xff] }
 0x28a   : > { %920 = vst [vmem:[#allocation3 + $0x10] sm:$0xf] %v919_v8  ;;  %v970_v11 = vrot.slane %v919_v8, 4  ;;  %v971_v12 = vrot.slane %v916_v7, 4  ;;  %v1162_v37 = vld [vmem:[#allocation3 + $0x138] sm:$0xff] }
 0x28b   : > { %921 = vst [vmem:[#allocation3 + $0xe8] sm:$0xf] %v916_v7  ;;  %v1157_v13 = vld [vmem:[#allocation3 + $0x48] sm:$0xff] }
 0x28c   : > { %974 = vst [vmem:[#allocation3 + $0x38] sm:$0xf0] %v970_v11  ;;  %1218 = vmatpush.msrb.mxu2 %v1157_v13  ;;  %v1158_v14 = vld [vmem:[#allocation3 + $0x118] sm:$0xff] }
 0x28d   : > { %975 = vst [vmem:[#allocation3 + $0x120] sm:$0xf0] %v971_v12  ;;  %1238 = vmatpush.msrb.mxu3 %v1158_v14  ;;  %v1145_v59 = vld [vmem:[#allocation3 + $0x60] sm:$0xff] }
 0x28e   : > { %1219 = vmatpush.msrb.mxu2 %v1149_v15  ;;  %v1033_v16 = vpop.permute.xlu0 %1032  ;;  %v1146_v50 = vld [vmem:[#allocation3 + $0x70] sm:$0xff]  ;;  %v979_v56 = vpop.permute.xlu2 %978  ;;  %v1163_v14 = vld [vmem:[#allocation3 + $0xc0] sm:$0xff] }
 0x28f   : > { %1239 = vmatpush.msrb.mxu3 %v1150_v30  ;;  %v1034_v17 = vsel %vm1011_vm13, %v1031_v22, %v1033_v16  ;;  %v1037_v18 = vsel %vm1011_vm13, %v1033_v16, 0.0  ;;  %v1140_v30 = vld [vmem:[#allocation3 + $0x110] sm:$0xff] }
 0x290   : > { %v1061_v19 = vpop.permute.xlu1 %1060  ;;  %v1038_v20 = vsel %vm989_vm14, %v1034_v17, 0.0  ;;  %v1039_v21 = vsel %vm990_vm15, %v1037_v18, 0.0  ;;  %v1134_v31 = vld [vmem:[#allocation3 + $0xe0] sm:$0xff]  ;;  %v1139_v17 = vld [vmem:[#allocation3 + $0x18] sm:$0xff] }
 0x291   : > { %v1065_v24 = vsel %vm1064_vm12, %v1061_v19, %v1063_v53  ;;  %1040 = vst [vmem:[#allocation3 + $0xf0] sm:$0xf] %v1038_v20  ;;  %v1109_v25 = vrot.slane %v1038_v20, 4  ;;  %v1110_v26 = vrot.slane %v1039_v21, 4  ;;  %v1141_v27 = vld [vmem:[#allocation3 + $0x10] sm:$0xff]  ;;  %v1153_v53 = vld [vmem:[#allocation3 + $0x80] sm:$0xff] }
 0x292   : > { %v1069_v28 = vsel %vm883_vm8, %v1065_v24, 0.0  ;;  %1041 = vst [vmem:[#allocation3 + $0x108] sm:$0xf] %v1039_v21  ;;  %1220 = vmatpush.msrb.mxu2 %v1141_v27  ;;  %v1142_v29 = vld [vmem:[#allocation3 + $0xe8] sm:$0xff] }
 0x293   : > { %v1073_v32 = vrot.slane %v1069_v28, 4  ;;  %1113 = vst [vmem:[#allocation3 + $0x40] sm:$0xf0] %v1109_v25  ;;  %1240 = vmatpush.msrb.mxu3 %v1142_v29  ;;  %v1135_v8 = vld [vmem:[#allocation3 + $0x38] sm:$0xff]  ;;  %v1396_v28 = vld [vmem:[%s2253_s10] sm:$0xf] }
 0x294   : > { %1114 = vst [vmem:[#allocation3 + $0x88] sm:$0xf0] %v1110_v26  ;;  %1221 = vmatpush.msrb.mxu2 %v1133_v33  ;;  %v1136_v10 = vld [vmem:[#allocation3 + $0x120] sm:$0xff] }
 0x295   : > { %1077 = vst [vmem:[#allocation3 + $0x128] sm:$0xf] %v1073_v32  ;;  %1241 = vmatpush.msrb.mxu3 %v1134_v31  ;;  %1791 = vmatmul.msk.f32.vlgmr.msrb.gmra.mxu2 %vm693_vm10, %v2159_v23 }
 0x296   : > { %1793 = vmatmul.msk.f32.vlgmr.msrb.gmra.mxu3 %vm693_vm10, %v2159_v23  ;;  %1798 = vmatpush.msk.msra.mxu2 %vm700_vm9, %v1169_v34  ;;  %v1008_v36 = vpop.permute.xlu0 %1007  ;;  %v1177_v18 = vpop.permute.xlu2 %1176 }
 0x297   : > { %1800 = vmatpush.msk.msra.mxu3 %vm700_vm9, %v1170_v35 }
 0x298   : > { %v1010_v38 = vpop.permute.xlu1 %1009  ;;  %v1167_v39 = vld [vmem:[#allocation3 + $0xf0] sm:$0xf] }
 0x299   : > { %1318 = vmatpush.msra.mxu3 %v1162_v37  ;;  %v1015_v40 = vsel %vm1011_vm13, %v1010_v38, 0.0  ;;  %v1012_v41 = vsel %vm1011_vm13, %v1008_v36, %v1010_v38  ;;  %1794 = vmatpush.msk.msrb.mxu0 %vm700_vm9, %v1167_v39  ;;  %v1168_v42 = vld [vmem:[#allocation3 + $0x108] sm:$0xf]  ;;  %v1623_v37 = vld.sshfl [vmem:[#allocation1 + $0x8] sm:$0xff pattern:$0x75316420] }
 0x29a   : > { %v1017_v43 = vsel %vm990_vm15, %v1015_v40, 0.0  ;;  %v1016_v44 = vsel %vm989_vm14, %v1012_v41, 0.0  ;;  %1796 = vmatpush.msk.msrb.mxu1 %vm700_vm9, %v1168_v42  ;;  %v1155_v22 = vld [vmem:[#allocation3 + $0x40] sm:$0xff] }
 0x29b   : > { %v1021_v47 = vrot.slane %v1017_v43, 4  ;;  %1102 = vst [vmem:[#allocation3 + $0xc8] sm:$0xf] %v1017_v43  ;;  %v1020_v48 = vrot.slane %v1016_v44, 4  ;;  %1319 = vmatpush.msra.mxu3 %v1154_v45  ;;  %1258 = vmatpush.msrb.mxu0 %v1159_v46  ;;  %v1156_v13 = vld [vmem:[#allocation3 + $0x88] sm:$0xff] }
 0x29c   : > { %1101 = vst [vmem:[#allocation3 + $0x90] sm:$0xf] %v1016_v44  ;;  %1278 = vmatpush.msrb.mxu1 %v1160_v49  ;;  %v1161_v51 = vld [vmem:[#allocation3 + $0x128] sm:$0xff] }
 0x29d   : > { %1025 = vst [vmem:[#allocation3 + $0xf8] sm:$0xf0] %v1021_v47  ;;  %1320 = vmatpush.msra.mxu3 %v1146_v50  ;;  %1298 = vmatpush.msra.mxu2 %v1161_v51  ;;  %v1622_v43 = vld.sshfl [vmem:[#allocation1] sm:$0xff pattern:$0x75316420] }
 0x29e   : > { %1024 = vst [vmem:[#allocation3 + $0x98] sm:$0xf0] %v1020_v48  ;;  %v1122_v54 = vpop.permute.xlu0 %1121  ;;  %v1620_v48 = vld [vmem:[%s2256_s13] sm:$0xf] }
 0x29f   : > { %1321 = vmatpush.msra.mxu3 %v1138_v52  ;;  %1299 = vmatpush.msra.mxu2 %v1153_v53  ;;  %v1127_v55 = vsel %vm1123_vm1, %v1122_v54, 0.0 }
 0x2a0   : > { %1801 = vmatmul.msk.f32.vlgmr.msra.gmra.mxu3 %vm693_vm10, %v2159_v23  ;;  %v977_v57 = vpop.permute.xlu1 %976  ;;  %v1129_v58 = vsel %vm990_vm15, %v1127_v55, 0.0 }
 0x2a1   : > { %v981_v60 = vsel %vm980_vm2, %v977_v57, %v979_v56  ;;  %v984_v61 = vsel %vm980_vm2, 0.0, %v977_v57  ;;  %1131 = vst [vmem:[#allocation3 + $0xb0] sm:$0xf] %v1129_v58  ;;  %1300 = vmatpush.msra.mxu2 %v1145_v59 }
 0x2a2   : > { %v997_v62 = vsel %vm989_vm14, %v984_v61, 0.0  ;;  %v998_v63 = vsel %vm990_vm15, %v981_v60, 0.0  ;;  %v1148_v15 = vld [vmem:[#allocation3 + $0xc8] sm:$0xff] }
 0x2a3   : > { %999 = vst [vmem:[#allocation3 + $0x20] sm:$0xf] %v997_v62  ;;  %1301 = vmatpush.msra.mxu2 %v1137_v0  ;;  %v1147_v16 = vld [vmem:[#allocation3 + $0x90] sm:$0xff] }
 0x2a4   : > { %1000 = vst [vmem:[#allocation3 + $0x58] sm:$0xf] %v998_v63  ;;  %1799 = vmatmul.msk.f32.vlgmr.msra.gmra.mxu2 %vm693_vm10, %v2159_v23  ;;  %v1152_v1 = vld [vmem:[#allocation3 + $0xf8] sm:$0xff] }
 0x2a5   : > { %v1151_v2 = vld [vmem:[#allocation3 + $0x98] sm:$0xff]  ;;  %1279 = vmatpush.msrb.mxu1 %v1152_v1 }
 0x2a6   : > { %1259 = vmatpush.msrb.mxu0 %v1151_v2  ;;  %v1378_v24 = vpop.permute.xlu0 %1377 }
 0x2a8   : > { %v1120_v3 = vpop.permute.xlu1 %1119  ;;  %v1172_v11 = vld [vmem:[#allocation3 + $0xb0] sm:$0xf] }
 0x2a9   : > { %v1124_v4 = vsel %vm1123_vm1, %v1120_v3, %v1122_v54  ;;  %v1880_v3 = vmov 256.0  }
 0x2aa   : > { %v1128_v5 = vsel %vm989_vm14, %v1124_v4, 0.0  ;;  %v1143_v6 = vld [vmem:[#allocation3 + $0x20] sm:$0xff]  ;;  %1856 = vrcp.f32 %v1880_v3 }
 0x2ab   : > { %1130 = vst [vmem:[#allocation3 + $0xb8] sm:$0xf] %v1128_v5  ;;  %1260 = vmatpush.msrb.mxu0 %v1143_v6  ;;  %v1144_v7 = vld [vmem:[#allocation3 + $0x58] sm:$0xff] }
 0x2ac   : > { %1280 = vmatpush.msrb.mxu1 %v1144_v7 }
 0x2ad   : > { %1261 = vmatpush.msrb.mxu0 %v1135_v8 }
 0x2ae   : > { %1281 = vmatpush.msrb.mxu1 %v1136_v10  ;;  %1795 = vmatmul.msk.f32.vlgmr.msrb.gmra.mxu0 %vm693_vm10, %v2159_v23 }
 0x2af   : > { %1797 = vmatmul.msk.f32.vlgmr.msrb.gmra.mxu1 %vm693_vm10, %v2159_v23 }
 0x2b0   : > { %1804 = vmatpush.msk.msra.mxu1 %vm700_vm9, %v1172_v11  ;;  %v1857_v4 = vpop.eup %1856  ;;  %v1401_v11 = vpop.permute.xlu1 %1400 }
 0x2b1   : > { %v1677_v6 = vmul.f32 256.0, %v1857_v4 }
 0x2b2   : > { %1358 = vmatpush.msra.mxu1 %v1164_v9  ;;  %v1171_v12 = vld [vmem:[#allocation3 + $0xb8] sm:$0xf] }
 0x2b3   : > { %1802 = vmatpush.msk.msra.mxu0 %vm700_vm9, %v1171_v12  ;;  %v1678_v8 = vsub.f32 1.0, %v1677_v6 }
 0x2b4   : > { %1359 = vmatpush.msra.mxu1 %v1156_v13 }
 0x2b5   : > { %1338 = vmatpush.msra.mxu0 %v1163_v14  ;;  %v1679_v10 = vmul.f32 %v1857_v4, %v1678_v8 }
 0x2b6   : > { %1360 = vmatpush.msra.mxu1 %v1148_v15 }
 0x2b7   : > { %1339 = vmatpush.msra.mxu0 %v1155_v22 }
 0x2b8   : > { %1361 = vmatpush.msra.mxu1 %v1140_v30  ;;  %v1680_v30 = vadd.f32 %v1857_v4, %v1679_v10 }
 0x2b9   : > { %1805 = vmatmul.msk.f32.vlgmr.msra.gmra.mxu1 %vm693_vm10, %v2159_v23  ;;  %1340 = vmatpush.msra.mxu0 %v1147_v16 }
 0x2bb   : > { %1341 = vmatpush.msra.mxu0 %v1139_v17 }
 0x2bc   : > { %1803 = vmatmul.msk.f32.vlgmr.msra.gmra.mxu0 %vm693_vm10, %v2159_v23 }
 0x318   : > { %v1223_v19 = vpop.f32.mrf.mxu2 }
 0x319   : > { %v1224_v20 = vadd.f32 %v1223_v19, %v1177_v18  ;;  %v1243_v21 = vpop.f32.mrf.mxu3 }
 0x31a   : > { %v1244_v25 = vadd.f32 %v1243_v21, %v1177_v18 }
 0x31b   : > { %vm1366_vm3 = vcmp.gt.f32.partialorder %v1224_v20, 0.0  ;;  %v1380_v26 = vmul.f32 %v1378_v24, %v1224_v20 }
 0x31c   : > { %vm1367_vm4 = vcmp.gt.f32.partialorder %v1244_v25, 0.0  ;;  %v1381_v27 = vmul.f32 %v1378_v24, %v1244_v25 }
 0x31d   : > { %v1388_v29 = vsel %vm1366_vm3, %v1224_v20, %v1380_v26 }
 0x31e   : > { %v1389_v31 = vsel %vm1367_vm4, %v1244_v25, %v1381_v27  ;;  %1806 = vmatpush.msk.msrb.mxu2 %vm700_vm9, %v1388_v29 }
 0x31f   : > { %1808 = vmatpush.msk.msrb.mxu3 %vm700_vm9, %v1389_v31  ;;  %1807 = vmatmul.msk.f32.vlgmr.msrb.gmra.mxu2 %vm578_vm0, %v1396_v28 }
 0x320   : > { %1809 = vmatmul.msk.f32.vlgmr.msrb.gmra.mxu3 %vm578_vm0, %v1396_v28 }
 0x323   : > { %v1323_v23 = vpop.f32.mrf.mxu3 }
 0x324   : > { %v1324_v32 = vadd.f32 %v1323_v23, %v1177_v18 }
 0x326   : > { %vm1371_vm10 = vcmp.gt.f32.partialorder %v1324_v32, 0.0  ;;  %v1385_v33 = vmul.f32 %v1378_v24, %v1324_v32 }
 0x327   : > { %v1303_v34 = vpop.f32.mrf.mxu2 }
 0x328   : > { %v1393_v35 = vsel %vm1371_vm10, %v1324_v32, %v1385_v33  ;;  %v1304_v36 = vadd.f32 %v1303_v34, %v1177_v18 }
 0x329   : > { %1816 = vmatpush.msk.msra.mxu3 %vm700_vm9, %v1393_v35 }
 0x32a   : > { %vm1370_vm5 = vcmp.gt.f32.partialorder %v1304_v36, 0.0  ;;  %v1384_v38 = vmul.f32 %v1378_v24, %v1304_v36  ;;  %1817 = vmatmul.msk.f32.vlgmr.msra.gmra.mxu3 %vm578_vm0, %v1396_v28 }
 0x32b   : > { %v1263_v39 = vpop.f32.mrf.mxu0  ;;  %1824 = vmatpush.msk.msrb.mxu3 %vm700_vm9, %v1623_v37 }
 0x32c   : > { %v1392_v40 = vsel %vm1370_vm5, %v1304_v36, %v1384_v38  ;;  %v1264_v41 = vadd.f32 %v1263_v39, %v1177_v18  ;;  %v1283_v42 = vpop.f32.mrf.mxu1 }
 0x32d   : > { %v1284_v44 = vadd.f32 %v1283_v42, %v1177_v18  ;;  %1814 = vmatpush.msk.msra.mxu2 %vm700_vm9, %v1392_v40 }
 0x32e   : > { %vm1368_vm6 = vcmp.gt.f32.partialorder %v1264_v41, 0.0  ;;  %v1382_v45 = vmul.f32 %v1378_v24, %v1264_v41  ;;  %1815 = vmatmul.msk.f32.vlgmr.msra.gmra.mxu2 %vm578_vm0, %v1396_v28 }
 0x32f   : > { %vm1369_vm7 = vcmp.gt.f32.partialorder %v1284_v44, 0.0  ;;  %v1383_v46 = vmul.f32 %v1378_v24, %v1284_v44  ;;  %1822 = vmatpush.msk.msrb.mxu2 %vm700_vm9, %v1622_v43 }
 0x330   : > { %v1390_v47 = vsel %vm1368_vm6, %v1264_v41, %v1382_v45 }
 0x331   : > { %v1391_v49 = vsel %vm1369_vm7, %v1284_v44, %v1383_v46  ;;  %1810 = vmatpush.msk.msrb.mxu0 %vm700_vm9, %v1390_v47 }
 0x332   : > { %1812 = vmatpush.msk.msrb.mxu1 %vm700_vm9, %v1391_v49  ;;  %1811 = vmatmul.msk.f32.vlgmr.msrb.gmra.mxu0 %vm578_vm0, %v1396_v28 }
 0x333   : > { %1813 = vmatmul.msk.f32.vlgmr.msrb.gmra.mxu1 %vm578_vm0, %v1396_v28  ;;  %1825 = vmatmul.msk.f32.vlgmr.msrb.gmra.mxu3 %vm578_vm0, %v1620_v48 }
 0x336   : > { %v1363_v50 = vpop.f32.mrf.mxu1  ;;  %1823 = vmatmul.msk.f32.vlgmr.msrb.gmra.mxu2 %vm578_vm0, %v1620_v48 }
 0x337   : > { %v1364_v51 = vadd.f32 %v1363_v50, %v1177_v18 }
 0x339   : > { %vm1373_vm8 = vcmp.gt.f32.partialorder %v1364_v51, 0.0  ;;  %v1387_v52 = vmul.f32 %v1378_v24, %v1364_v51  ;;  %v1343_v53 = vpop.f32.mrf.mxu0 }
 0x33a   : > { %v1344_v54 = vadd.f32 %v1343_v53, %v1177_v18  ;;  %v1602_v18 = vpop.permute.xlu2 %1601 }
 0x33b   : > { %v1395_v55 = vsel %vm1373_vm8, %v1364_v51, %v1387_v52 }
 0x33c   : > { %vm1372_vm11 = vcmp.gt.f32.partialorder %v1344_v54, 0.0  ;;  %v1386_v56 = vmul.f32 %v1378_v24, %v1344_v54  ;;  %1820 = vmatpush.msk.msra.mxu1 %vm700_vm9, %v1395_v55 }
 0x33d   : > { %1821 = vmatmul.msk.f32.vlgmr.msra.gmra.mxu1 %vm578_vm0, %v1396_v28 }
 0x33e   : > { %v1394_v57 = vsel %vm1372_vm11, %v1344_v54, %v1386_v56 }
 0x33f   : > { %1818 = vmatpush.msk.msra.mxu0 %vm700_vm9, %v1394_v57 }
 0x340   : > { %1819 = vmatmul.msk.f32.vlgmr.msra.gmra.mxu0 %vm578_vm0, %v1396_v28  ;;  %vm1681_vm0 = vweird.f32 %v1857_v4 }
 0x341   : > { %v1682_v27 = vsel %vm1681_vm0, %v1857_v4, %v1680_v30 }
 0x3a2   : > { %v1447_v59 = vpop.f32.mrf.mxu2 }
 0x3a3   : > { %v1467_v58 = vpop.f32.mrf.mxu3  ;;  %v1448_v12 = vadd.f32 %v1447_v59, %v1401_v11 }
 0x3a4   : > { %v1468_v13 = vadd.f32 %v1467_v58, %v1401_v11 }
 0x3a5   : > { %vm1590_vm12 = vcmp.gt.f32.partialorder %v1448_v12, 0.0  ;;  %v1604_v21 = vmul.f32 %v1602_v18, %v1448_v12 }
 0x3a6   : > { %vm1591_vm13 = vcmp.gt.f32.partialorder %v1468_v13, 0.0  ;;  %v1605_v24 = vmul.f32 %v1602_v18, %v1468_v13 }
 0x3a7   : > { %v1612_v34 = vsel %vm1590_vm12, %v1448_v12, %v1604_v21 }
 0x3a8   : > { %v1613_v35 = vsel %vm1591_vm13, %v1468_v13, %v1605_v24 }
 0x3ad   : > { %v1547_v60 = vpop.f32.mrf.mxu3 }
 0x3ae   : > { %v1548_v15 = vadd.f32 %v1547_v60, %v1401_v11 }
 0x3af   : > { %v1487_v7 = vpop.f32.mrf.mxu0 }
 0x3b0   : > { %v1507_v5 = vpop.f32.mrf.mxu1  ;;  %v1488_v16 = vadd.f32 %v1487_v7, %v1401_v11  ;;  %v1609_v25 = vmul.f32 %v1602_v18, %v1548_v15  ;;  %vm1595_vm14 = vcmp.gt.f32.partialorder %v1548_v15, 0.0 }
 0x3b1   : > { %v1527_v61 = vpop.f32.mrf.mxu2  ;;  %v1508_v22 = vadd.f32 %v1507_v5, %v1401_v11 }
 0x3b2   : > { %v1528_v19 = vadd.f32 %v1527_v61, %v1401_v11  ;;  %v1606_v28 = vmul.f32 %v1602_v18, %v1488_v16  ;;  %vm1592_vm1 = vcmp.gt.f32.partialorder %v1488_v16, 0.0  ;;  %v1617_v36 = vsel %vm1595_vm14, %v1548_v15, %v1609_v25 }
 0x3b3   : > { %v1607_v26 = vmul.f32 %v1602_v18, %v1508_v22  ;;  %vm1593_vm15 = vcmp.gt.f32.partialorder %v1508_v22, 0.0 }
 0x3b4   : > { %v1608_v31 = vmul.f32 %v1602_v18, %v1528_v19  ;;  %vm1594_vm3 = vcmp.gt.f32.partialorder %v1528_v19, 0.0  ;;  %v1614_v38 = vsel %vm1592_vm1, %v1488_v16, %v1606_v28 }
 0x3b5   : > { %v1615_v37 = vsel %vm1593_vm15, %v1508_v22, %v1607_v26 }
 0x3b6   : > { %v1668_v62 = vpop.f32.mrf.mxu3  ;;  %v1616_v42 = vsel %vm1594_vm3, %v1528_v19, %v1608_v31 }
 0x3b7   : > { %v1672_v63 = vsel %vm700_vm9, %v1668_v62, 0.0 }
 0x3b9   : > { %v1648_v0 = vpop.f32.mrf.mxu2 }
 0x3ba   : > { %v1671_v1 = vsel %vm700_vm9, %v1648_v0, 0.0  ;;  %v1587_v9 = vpop.f32.mrf.mxu1 }
 0x3bb   : > { %v1673_v2 = vadd.f32 %v1672_v63, %v1671_v1  ;;  %v1588_v17 = vadd.f32 %v1587_v9, %v1401_v11 }
 0x3bd   : > { %1674 = vadd.xlane.f32.xlu0 %v1673_v2  ;;  %v1567_v14 = vpop.f32.mrf.mxu0  ;;  %v1611_v29 = vmul.f32 %v1602_v18, %v1588_v17  ;;  %vm1597_vm2 = vcmp.gt.f32.partialorder %v1588_v17, 0.0 }
 0x3be   : > { %v1568_v20 = vadd.f32 %v1567_v14, %v1401_v11 }
 0x3bf   : > { %v1619_v39 = vsel %vm1597_vm2, %v1588_v17, %v1611_v29 }
 0x3c0   : > { %v1610_v23 = vmul.f32 %v1602_v18, %v1568_v20  ;;  %vm1596_vm4 = vcmp.gt.f32.partialorder %v1568_v20, 0.0 }
 0x3c2   : > { %v1618_v43 = vsel %vm1596_vm4, %v1568_v20, %v1610_v23 }
 0x430   : > { %v1675_v32 = vpop.xlane.xlu0 %1674 }
 0x431   : > { %v1683_v33 = vmul.f32 %v1682_v27, %v1675_v32 }
 0x433   : > { %v1685_v40 = vadd.f32 %v1683_v33, %v1613_v35  ;;  %v1687_v41 = vadd.f32 %v1683_v33, %v1615_v37  ;;  %v1689_v44 = vadd.f32 %v1683_v33, %v1617_v36  ;;  %v1691_v45 = vadd.f32 %v1683_v33, %v1619_v39 }
 0x434   : > { %v1684_v46 = vadd.f32 %v1683_v33, %v1612_v34  ;;  %v1686_v47 = vadd.f32 %v1683_v33, %v1614_v38  ;;  %v1688_v50 = vadd.f32 %v1683_v33, %v1616_v42  ;;  %v1690_v51 = vadd.f32 %v1683_v33, %v1618_v43 }
 0x435   : > { %v1700_v48 = vrot.slane %v1685_v40, 4  ;;  %v1701_v49 = vrot.slane %v1687_v41, 4  ;;  %v1702_v52 = vrot.slane %v1689_v44, 4  ;;  %v1703_v53 = vrot.slane %v1691_v45, 4 }
 0x437   : > { %v1704_v54 = vsel %vm700_vm9, %v1684_v46, %v1700_v48  ;;  %v1705_v55 = vsel %vm700_vm9, %v1686_v47, %v1701_v49  ;;  %v1706_v56 = vsel %vm700_vm9, %v1688_v50, %v1702_v52  ;;  %v1707_v57 = vsel %vm700_vm9, %v1690_v51, %v1703_v53 }
 0x438   : > { %1712 = vst [vmem:[%s467_s17] sm:$0xff] %v1704_v54 }
 0x439   : > { %1713 = vst [vmem:[%s467_s17 + $0x8] sm:$0xff] %v1705_v55 }
 0x43a   : > { %1714 = vst [vmem:[%s467_s17 + $0x10] sm:$0xff] %v1706_v56 }
 0x43b   : > { %1715 = vst [vmem:[%s467_s17 + $0x18] sm:$0xff] %v1707_v57 }
 0x43c PF: > { %s24_s29 = sadd.s32 1, %s1864_s29  }
 0x43d   : > { %p21_p4 = scmp.ge.s32.totalorder %s24_s29, 4  }
 0x43f   :  { %23 = sbr.rel (!%p21_p4) target bundleno = 1 (0x1), region = 106 }

</bundles_post_ra>
